<compile_context>
chip_gen: v7x
topology: tpu7x:2x2x1
jax: 0.10.0
libtpu: 0.0.40
codegen_flags: <defaults>
</compile_context>

<pallas_src>
import functools
import math

import jax
import jax.numpy as jnp
from jax.experimental import pallas as pl
from jax.experimental.pallas import tpu as pltpu

_PREC = jax.lax.Precision.HIGHEST


def stargnn_kernel(
    # per-chunk (grid) inputs
    a_in_ref, a_out_ref, h_ref, mask_ref,
    # shared inputs (constant block index -> resident in VMEM across the grid)
    gsel_ref, w_hede_ref, b_hede_ref, b_iah_ref, b_oah_ref,
    w_ih_in_ref, w_ih_out_ref, b_ih_ref, p12_ref, u12_ref,
    wg0_ref, wg1_ref, bg_ref,
    # outputs
    out_h_ref, out_s_ref,
    *, step: int, nodes_per_graph: int,
):
    N = nodes_per_graph
    CN, H = h_ref.shape[1], h_ref.shape[2]
    C = CN // N
    inv_sqrt_h = 1.0 / math.sqrt(H)
    f32 = jnp.float32

    # MXU operand dtype: bf16 (single MXU pass) in fast mode, f32 @ HIGHEST in strict mode.
    cdt = w_hede_ref.dtype
    strict = cdt == jnp.float32
    prec = jax.lax.Precision.HIGHEST if strict else jax.lax.Precision.DEFAULT

    def mm(x, w):  # MXU matmul, f32 accumulation
        return jnp.dot(x.astype(cdt), w.astype(cdt), precision=prec,
                       preferred_element_type=f32)

    def recip(x):  # EUP approximate reciprocal in fast mode only
        return (1.0 / x) if strict else pl.reciprocal(x, approx=True)

    def nsum(x):   # per-graph sum over nodes: (CN, K) -> (C, K)  (tile-exact reshape)
        return jnp.sum(x.reshape(C, N, x.shape[-1]), axis=1)

    def nbcast(x):  # per-graph rows -> per-node rows: (C, K) -> (CN, K)
        return jnp.broadcast_to(x[:, None, :], (C, N, x.shape[-1])).reshape(C * N, x.shape[-1])

    # ---- hoisted per-invocation loads (elementwise math stays f32) ----
    a_in = a_in_ref[0]          # (CN, CN) block-diagonal incoming-edge adjacency
    a_out = a_out_ref[0]        # (CN, CN) outgoing-edge adjacency
    h0 = h_ref[0]               # (CN, H)
    mask = mask_ref[0]          # (C, N)
    own = gsel_ref[...] > 0.5   # (CN, C) node-belongs-to-graph mask
    b_hede = b_hede_ref[...]    # (1, 5H)
    b_iah = b_iah_ref[...]      # (1, H)
    b_oah = b_oah_ref[...]      # (1, H)
    b_ih = b_ih_ref[...]        # (1, 3H)
    u12 = u12_ref[...]          # (1, 2H)

    def graph_softmax(logits):  # per-graph softmax over nodes, logits: (CN, 1) -> (CN, 1)
        lm = jnp.where(own, logits, -1e30)          # (CN, C): one graph per column
        m = jnp.max(lm, axis=0, keepdims=True)      # (1, C) per-graph max
        e = jnp.exp(lm - m)                          # off-column entries underflow to 0
        denom = jnp.sum(e, axis=0, keepdims=True)   # (1, C) per-graph denominator
        return jnp.sum(e * recip(denom), axis=-1, keepdims=True)

    # ---- star node init: s_g = sum_nodes(hidden) / (sum(mask) + 1e-6) ----
    cnt = jnp.sum(mask, axis=-1, keepdims=True)     # (C, 1)
    s = nsum(h0) * recip(cnt + 1e-6)                # (C, H)

    hidden = h0
    for _ in range(step):
        # -------- GNNCell: fused (H, 5H) projection of `hidden` --------
        hg = mm(hidden, w_hede_ref[...]) + b_hede                    # (CN, 5H)
        eh_in = hg[:, 0 * H:1 * H]
        eh_out = hg[:, 1 * H:2 * H]
        input_in = mm(a_in, eh_in) + b_iah                           # (CN, H)
        input_out = mm(a_out, eh_out) + b_oah                        # (CN, H)
        gi = (mm(input_in, w_ih_in_ref[...])
              + mm(input_out, w_ih_out_ref[...]) + b_ih)             # (CN, 3H)
        resetgate = jax.nn.sigmoid(gi[:, :H] + hg[:, 2 * H:3 * H])
        inputgate = jax.nn.sigmoid(gi[:, H:2 * H] + hg[:, 3 * H:4 * H])
        newgate = jnp.tanh(gi[:, 2 * H:] + resetgate * hg[:, 4 * H:])
        hidden1 = newgate + inputgate * (hidden - newgate)

        # -------- per-graph attention vectors from the star node --------
        # v1_g = Wk1(s_g) @ Wq1, v2_g = Wk2(s_g) @ Wq2  (Wk.Wq folded once in wrapper)
        v12 = mm(s, p12_ref[...]) + u12                              # (C, 2H)

        # satellite <- star (alpha): logit_i = hidden1_i . v1_{g(i)} / sqrt(H)
        # (the per-graph constant bq.k term cancels under the per-graph softmax)
        logits1 = jnp.sum(hidden1 * nbcast(v12[:, :H]), axis=-1,
                          keepdims=True) * inv_sqrt_h                # (CN, 1)
        alpha = graph_softmax(logits1)
        s_nodes = nbcast(s)                                          # (CN, H)
        hidden = (1.0 - alpha) * hidden1 + alpha * s_nodes

        # star <- satellites (beta)
        logits2 = jnp.sum(hidden * nbcast(v12[:, H:]), axis=-1,
                          keepdims=True) * inv_sqrt_h
        beta = graph_softmax(logits2)
        s = nsum(beta * hidden)                                      # (C, H)

    # -------- highway gate --------
    g = jax.nn.sigmoid(mm(h0, wg0_ref[...]) + mm(hidden, wg1_ref[...]) + bg_ref[...])
    out_h_ref[0] = g * h0 + (1.0 - g) * hidden
    out_s_ref[0] = s


def _default_num_chunks(batch):
    """Split the folded batch in two on dual-TensorCore chips (v7x); 1 elsewhere."""
    try:
        kind = jax.devices()[0].device_kind.lower()
    except Exception:
        kind = ""
    dual_tc = any(tag in kind for tag in ("v7", "tpu7", "7x"))
    return 2 if (dual_tc and batch % 2 == 0) else 1


def stargnn_forward(A, hidden, mask, params, step=1, use_bf16=True, num_chunks=None):
    """A: (B, N, 2N), hidden: (B, N, H), mask: (B, N). Returns (hidden', s)."""
    f32 = jnp.float32
    cdt = jnp.bfloat16 if use_bf16 else f32      # MXU operand dtype
    B, N, H = hidden.shape
    if num_chunks is None:
        num_chunks = _default_num_chunks(B)
    if B % num_chunks:
        raise ValueError("batch must be divisible by num_chunks")
    C = B // num_chunks                          # graphs per chunk
    CN = C * N                                   # folded node rows per chunk

    A = A.astype(f32)
    hidden = hidden.astype(f32)
    mask = mask.astype(f32)

    # ---- fold the batch into the matmul M dimension (block-diagonal adjacency) ----
    eye = jnp.eye(C, dtype=f32)

    def blockdiag(a):  # (num_chunks, C, N, N) -> (num_chunks, CN, CN)
        return jnp.einsum("xgij,gh->xgihj", a, eye).reshape(num_chunks, CN, CN)

    a_in_bd = blockdiag(A[:, :, :N].reshape(num_chunks, C, N, N)).astype(cdt)
    a_out_bd = blockdiag(A[:, :, N:2 * N].reshape(num_chunks, C, N, N)).astype(cdt)
    h_fold = hidden.reshape(num_chunks, CN, H)
    mask_fold = mask.reshape(num_chunks, C, N)
    gid = jnp.repeat(jnp.arange(C), N)
    gsel = (gid[:, None] == jnp.arange(C)[None, :]).astype(f32)      # (CN, C) one-hot

    # ---- weights: pre-transpose / fuse / fold once; MXU operands cast to bf16 ----
    def t(w):   # torch nn.Linear weight (out, in) -> (in, out) so the kernel does x @ w
        return jnp.asarray(w, f32).T

    def r(b):   # bias (K,) -> (1, K)
        return jnp.asarray(b, f32).reshape(1, -1)

    p = params
    # edge_in | edge_out | w_hh fused: one (H, 5H) projection of `hidden`
    w_hede = jnp.concatenate([t(p["w_edge_in"]), t(p["w_edge_out"]), t(p["w_hh"])],
                             axis=1).astype(cdt)
    b_hede = jnp.concatenate([r(p["b_edge_in"]), r(p["b_edge_out"]), r(p["b_hh"])], axis=1)
    # cat([input_in, input_out]) @ w_ih.T == input_in @ w_ih.T[:H] + input_out @ w_ih.T[H:]
    w_ih_t = t(p["w_ih"])                         # (2H, 3H)
    w_ih_in = w_ih_t[:H].astype(cdt)
    w_ih_out = w_ih_t[H:].astype(cdt)
    # attention fold: q_i.k_g = hidden_i . (Wk(s_g) @ Wq) + const(g)
    wq1 = jnp.asarray(p["wq1_w"], f32)
    wq2 = jnp.asarray(p["wq2_w"], f32)
    p12 = jnp.concatenate(
        [jnp.matmul(t(p["wk1_w"]), wq1, precision=_PREC),
         jnp.matmul(t(p["wk2_w"]), wq2, precision=_PREC)], axis=1).astype(cdt)   # (H, 2H)
    u12 = jnp.concatenate(
        [jnp.matmul(r(p["wk1_b"]), wq1, precision=_PREC),
         jnp.matmul(r(p["wk2_b"]), wq2, precision=_PREC)], axis=1)               # (1, 2H)
    wg_t = t(p["wg_w"])                           # (2H, H)
    wg0 = wg_t[:H].astype(cdt)
    wg1 = wg_t[H:].astype(cdt)

    chunk_inputs = (a_in_bd, a_out_bd, h_fold, mask_fold)
    shared_inputs = (gsel, w_hede, b_hede, r(p["b_iah"]), r(p["b_oah"]),
                     w_ih_in, w_ih_out, r(p["b_ih"]), p12, u12, wg0, wg1, r(p["wg_b"]))

    def chunk_spec(a):
        return pl.BlockSpec((1,) + tuple(a.shape[1:]), lambda b: (b, 0, 0))

    def shared_spec(a):
        # Constant block index -> weights stay resident in VMEM across the whole grid.
        # (Single-buffering via pl.Buffered(1) is possible but irrelevant at this footprint.)
        return pl.BlockSpec(tuple(a.shape), lambda b: (0, 0))

    in_specs = [chunk_spec(a) for a in chunk_inputs] + [shared_spec(a) for a in shared_inputs]
    out_shape = (jax.ShapeDtypeStruct((num_chunks, CN, H), f32),
                 jax.ShapeDtypeStruct((num_chunks, C, H), f32))
    out_specs = (pl.BlockSpec((1, CN, H), lambda b: (b, 0, 0)),
                 pl.BlockSpec((1, C, H), lambda b: (b, 0, 0)))

    # Advisory cost estimate so XLA schedules sensibly around this microsecond-scale call.
    macs_step = (CN * H * 5 * H + 2 * CN * CN * H + 2 * CN * H * 3 * H + C * H * 2 * H)
    macs = num_chunks * (step * macs_step + CN * H * 2 * H)
    in_bytes = sum(int(x.size) * x.dtype.itemsize for x in chunk_inputs + shared_inputs)
    out_bytes = 4 * num_chunks * (CN * H + C * H)
    cost = pl.CostEstimate(
        flops=int(2 * macs),
        transcendentals=int(num_chunks * (step * (3 * CN * H + 2 * CN * C) + CN * H)),
        bytes_accessed=int(in_bytes + out_bytes))

    out_h, out_s = pl.pallas_call(
        functools.partial(stargnn_kernel, step=step, nodes_per_graph=N),
        grid=(num_chunks,),
        in_specs=in_specs,
        out_specs=out_specs,
        out_shape=out_shape,
        compiler_params=pltpu.CompilerParams(dimension_semantics=("parallel",)),
        cost_estimate=cost,
    )(*chunk_inputs, *shared_inputs)

    return out_h.reshape(B, N, H), out_s.reshape(B, 1, H)


# ----------------------- pure-JAX reference (torch semantics) -----------------------
def stargnn_reference(A, hidden, mask, p, step=1):
    B, N, H = hidden.shape
    A = A.astype(jnp.float32)
    hidden = hidden.astype(jnp.float32)
    mask = mask.astype(jnp.float32)

    def lin(x, w, b):
        return jnp.matmul(x, w.T, precision=_PREC) + b

    s = jnp.sum(hidden, axis=1) / (jnp.sum(mask, axis=1) + 1e-6)[:, None]
    s = s[:, None, :]
    hidden0 = hidden
    h = hidden
    for _ in range(step):
        input_in = jnp.matmul(A[:, :, :N], lin(h, p["w_edge_in"], p["b_edge_in"]),
                              precision=_PREC) + p["b_iah"]
        input_out = jnp.matmul(A[:, :, N:2 * N], lin(h, p["w_edge_out"], p["b_edge_out"]),
                               precision=_PREC) + p["b_oah"]
        inputs = jnp.concatenate([input_in, input_out], axis=2)
        gi = lin(inputs, p["w_ih"], p["b_ih"])
        gh = lin(h, p["w_hh"], p["b_hh"])
        i_r, i_i, i_n = jnp.split(gi, 3, axis=2)
        h_r, h_i, h_n = jnp.split(gh, 3, axis=2)
        resetgate = jax.nn.sigmoid(i_r + h_r)
        inputgate = jax.nn.sigmoid(i_i + h_i)
        newgate = jnp.tanh(i_n + resetgate * h_n)
        hidden1 = newgate + inputgate * (h - newgate)

        alpha = jnp.matmul(lin(hidden1, p["wq1_w"], p["wq1_b"]),
                           jnp.swapaxes(lin(s, p["wk1_w"], p["wk1_b"]), 1, 2),
                           precision=_PREC) / math.sqrt(H)
        alpha = jax.nn.softmax(alpha, axis=1)
        h = (1.0 - alpha) * hidden1 + alpha * s
        beta = jnp.matmul(lin(h, p["wq2_w"], p["wq2_b"]),
                          jnp.swapaxes(lin(s, p["wk2_w"], p["wk2_b"]), 1, 2),
                          precision=_PREC) / math.sqrt(H)
        beta = jax.nn.softmax(beta, axis=1)
        s = jnp.sum(beta * h, axis=1, keepdims=True)

    g = jax.nn.sigmoid(lin(jnp.concatenate([hidden0, h], axis=-1), p["wg_w"], p["wg_b"]))
    h_out = g * hidden0 + (1.0 - g) * h
    return h_out, s


def init_params(key, hidden_size):
    H = hidden_size
    stdv = 1.0 / math.sqrt(H)
    shapes = {
        "w_ih": (3 * H, 2 * H), "w_hh": (3 * H, H),
        "b_ih": (3 * H,), "b_hh": (3 * H,),
        "b_iah": (H,), "b_oah": (H,),
        "w_edge_in": (H, H), "b_edge_in": (H,),
        "w_edge_out": (H, H), "b_edge_out": (H,),
        "wq1_w": (H, H), "wq1_b": (H,),
        "wk1_w": (H, H), "wk1_b": (H,),
        "wq2_w": (H, H), "wq2_b": (H,),
        "wk2_w": (H, H), "wk2_b": (H,),
        "wg_w": (H, 2 * H), "wg_b": (H,),
    }
    keys = jax.random.split(key, len(shapes))
    return {name: jax.random.uniform(k, shp, jnp.float32, -stdv, stdv)
            for (name, shp), k in zip(shapes.items(), keys)}


if __name__ == "__main__":
    key = jax.random.PRNGKey(0)
    k_par, k_a, k_h = jax.random.split(key, 3)

    # 4 session graphs, 8 nodes each, hidden_size 128 (lane-dense), step=1 (module default)
    B, N, H, STEP = 4, 8, 128, 1

    params = init_params(k_par, H)
    A = jax.random.uniform(k_a, (B, N, 2 * N), dtype=jnp.float32)
    A = A / (jnp.sum(A, axis=1, keepdims=True) + 1e-6)   # normalized adjacency-like
    hidden = jax.random.normal(k_h, (B, N, H), dtype=jnp.float32)
    lens = jnp.array([N, 6, 5, 3], dtype=jnp.int32)
    mask = (jnp.arange(N)[None, :] < lens[:, None]).astype(jnp.float32)

    def check(out, ref, tol, tag):
        oh, os_ = out
        rh, rs = ref
        assert oh.shape == (B, N, H) and os_.shape == (B, 1, H)
        assert jnp.allclose(oh, rh, rtol=tol, atol=tol), \
            f"{tag}: hidden mismatch, max abs err {float(jnp.max(jnp.abs(oh - rh)))}"
        assert jnp.allclose(os_, rs, rtol=tol, atol=tol), \
            f"{tag}: s mismatch, max abs err {float(jnp.max(jnp.abs(os_ - rs)))}"

    ref1 = stargnn_reference(A, hidden, mask, params, step=STEP)

    # 1) fast path: bf16 MXU operands, auto chunking (2 on v7x, 1 on v5e/v6e).
    #    Tolerance reflects single-pass bf16 MXU operands (f32 accumulation).
    out_fast = jax.block_until_ready(stargnn_forward(A, hidden, mask, params, step=STEP))
    check(out_fast, ref1, 5e-2, "bf16")

    # 2) strict path: f32 @ HIGHEST MXU operands, exact divides -> tight tolerance.
    out_strict = jax.block_until_ready(
        stargnn_forward(A, hidden, mask, params, step=STEP, use_bf16=False))
    check(out_strict, ref1, 2e-3, "f32-strict")

    # 3) multi-step + explicit 2-chunk grid (exercises the v7x megacore path everywhere).
    ref2 = stargnn_reference(A, hidden, mask, params, step=2)
    out2 = jax.block_until_ready(
        stargnn_forward(A, hidden, mask, params, step=2, num_chunks=2))
    check(out2, ref2, 7e-2, "bf16-step2-2chunks")

    print("KERNEL_OK")
</pallas_src>

<mosaic_0001>
module attributes {stable_mosaic.version = 11 : i64} {
  func.func @stargnn_kernel(%arg0: i32, %arg1: memref<1x32x32xbf16, #tpu.memory_space<vmem>>, %arg2: memref<1x32x32xbf16, #tpu.memory_space<vmem>>, %arg3: memref<1x32x128xf32, #tpu.memory_space<vmem>>, %arg4: memref<1x4x8xf32, #tpu.memory_space<vmem>>, %arg5: memref<32x4xf32, #tpu.memory_space<vmem>>, %arg6: memref<128x640xbf16, #tpu.memory_space<vmem>>, %arg7: memref<1x640xf32, #tpu.memory_space<vmem>>, %arg8: memref<1x128xf32, #tpu.memory_space<vmem>>, %arg9: memref<1x128xf32, #tpu.memory_space<vmem>>, %arg10: memref<128x384xbf16, #tpu.memory_space<vmem>>, %arg11: memref<128x384xbf16, #tpu.memory_space<vmem>>, %arg12: memref<1x384xf32, #tpu.memory_space<vmem>>, %arg13: memref<128x256xbf16, #tpu.memory_space<vmem>>, %arg14: memref<1x256xf32, #tpu.memory_space<vmem>>, %arg15: memref<128x128xbf16, #tpu.memory_space<vmem>>, %arg16: memref<128x128xbf16, #tpu.memory_space<vmem>>, %arg17: memref<1x128xf32, #tpu.memory_space<vmem>>, %arg18: memref<1x32x128xf32, #tpu.memory_space<vmem>>, %arg19: memref<1x4x128xf32, #tpu.memory_space<vmem>>) attributes {dimension_semantics = [#tpu.dimension_semantics<parallel>], iteration_bounds = array<i64: 1>, scalar_prefetch = 0 : i64, scratch_operands = 0 : i64, tpu.core_type = #tpu.core_type<tc>, window_params = [{transform_indices = @transform_0, window_bounds = array<i64: 1, 32, 32>}, {transform_indices = @transform_1, window_bounds = array<i64: 1, 32, 32>}, {transform_indices = @transform_2, window_bounds = array<i64: 1, 32, 128>}, {transform_indices = @transform_3, window_bounds = array<i64: 1, 4, 8>}, {pipeline_mode = #tpu.pipeline_mode<synchronous>, transform_indices = @transform_4, window_bounds = array<i64: 32, 4>}, {pipeline_mode = #tpu.pipeline_mode<synchronous>, transform_indices = @transform_5, window_bounds = array<i64: 128, 640>}, {pipeline_mode = #tpu.pipeline_mode<synchronous>, transform_indices = @transform_6, window_bounds = array<i64: 1, 640>}, {pipeline_mode = #tpu.pipeline_mode<synchronous>, transform_indices = @transform_7, window_bounds = array<i64: 1, 128>}, {pipeline_mode = #tpu.pipeline_mode<synchronous>, transform_indices = @transform_8, window_bounds = array<i64: 1, 128>}, {pipeline_mode = #tpu.pipeline_mode<synchronous>, transform_indices = @transform_9, window_bounds = array<i64: 128, 384>}, {pipeline_mode = #tpu.pipeline_mode<synchronous>, transform_indices = @transform_10, window_bounds = array<i64: 128, 384>}, {pipeline_mode = #tpu.pipeline_mode<synchronous>, transform_indices = @transform_11, window_bounds = array<i64: 1, 384>}, {pipeline_mode = #tpu.pipeline_mode<synchronous>, transform_indices = @transform_12, window_bounds = array<i64: 128, 256>}, {pipeline_mode = #tpu.pipeline_mode<synchronous>, transform_indices = @transform_13, window_bounds = array<i64: 1, 256>}, {pipeline_mode = #tpu.pipeline_mode<synchronous>, transform_indices = @transform_14, window_bounds = array<i64: 128, 128>}, {pipeline_mode = #tpu.pipeline_mode<synchronous>, transform_indices = @transform_15, window_bounds = array<i64: 128, 128>}, {pipeline_mode = #tpu.pipeline_mode<synchronous>, transform_indices = @transform_16, window_bounds = array<i64: 1, 128>}, {transform_indices = @transform_17, window_bounds = array<i64: 1, 32, 128>}, {transform_indices = @transform_18, window_bounds = array<i64: 1, 4, 128>}]} {
    %c0 = arith.constant 0 : index
    %c0_0 = arith.constant 0 : index
    %c0_1 = arith.constant 0 : index
    %0 = vector.load %arg1[%c0, %c0_0, %c0_1] : memref<1x32x32xbf16, #tpu.memory_space<vmem>>, vector<1x32x32xbf16>
    %1 = vector.shape_cast %0 : vector<1x32x32xbf16> to vector<32x32xbf16>
    %c0_2 = arith.constant 0 : index
    %c0_3 = arith.constant 0 : index
    %c0_4 = arith.constant 0 : index
    %2 = vector.load %arg2[%c0_2, %c0_3, %c0_4] : memref<1x32x32xbf16, #tpu.memory_space<vmem>>, vector<1x32x32xbf16>
    %3 = vector.shape_cast %2 : vector<1x32x32xbf16> to vector<32x32xbf16>
    %c0_5 = arith.constant 0 : index
    %c0_6 = arith.constant 0 : index
    %c0_7 = arith.constant 0 : index
    %4 = vector.load %arg3[%c0_5, %c0_6, %c0_7] : memref<1x32x128xf32, #tpu.memory_space<vmem>>, vector<1x32x128xf32>
    %5 = vector.shape_cast %4 : vector<1x32x128xf32> to vector<32x128xf32>
    %c0_8 = arith.constant 0 : index
    %c0_9 = arith.constant 0 : index
    %c0_10 = arith.constant 0 : index
    %6 = vector.load %arg4[%c0_8, %c0_9, %c0_10] : memref<1x4x8xf32, #tpu.memory_space<vmem>>, vector<1x4x8xf32>
    %7 = vector.shape_cast %6 : vector<1x4x8xf32> to vector<4x8xf32>
    %c0_11 = arith.constant 0 : index
    %c0_12 = arith.constant 0 : index
    %8 = vector.load %arg5[%c0_11, %c0_12] : memref<32x4xf32, #tpu.memory_space<vmem>>, vector<32x4xf32>
    %cst = arith.constant 5.000000e-01 : f32
    %9 = vector.broadcast %cst : f32 to vector<32x4xf32>
    %10 = arith.cmpf ogt, %8, %9 : vector<32x4xf32>
    %c0_13 = arith.constant 0 : index
    %c0_14 = arith.constant 0 : index
    %11 = vector.load %arg7[%c0_13, %c0_14] : memref<1x640xf32, #tpu.memory_space<vmem>>, vector<1x640xf32>
    %c0_15 = arith.constant 0 : index
    %c0_16 = arith.constant 0 : index
    %12 = vector.load %arg8[%c0_15, %c0_16] : memref<1x128xf32, #tpu.memory_space<vmem>>, vector<1x128xf32>
    %c0_17 = arith.constant 0 : index
    %c0_18 = arith.constant 0 : index
    %13 = vector.load %arg9[%c0_17, %c0_18] : memref<1x128xf32, #tpu.memory_space<vmem>>, vector<1x128xf32>
    %c0_19 = arith.constant 0 : index
    %c0_20 = arith.constant 0 : index
    %14 = vector.load %arg12[%c0_19, %c0_20] : memref<1x384xf32, #tpu.memory_space<vmem>>, vector<1x384xf32>
    %c0_21 = arith.constant 0 : index
    %c0_22 = arith.constant 0 : index
    %15 = vector.load %arg14[%c0_21, %c0_22] : memref<1x256xf32, #tpu.memory_space<vmem>>, vector<1x256xf32>
    %cst_23 = arith.constant dense<0.000000e+00> : vector<4xf32>
    %16 = vector.multi_reduction <add>, %7, %cst_23 [1] : vector<4x8xf32> to vector<4xf32>
    %17 = vector.shape_cast %16 : vector<4xf32> to vector<4x1xf32>
    %18 = vector.shape_cast %5 : vector<32x128xf32> to vector<4x8x128xf32>
    %cst_24 = arith.constant dense<0.000000e+00> : vector<4x128xf32>
    %19 = vector.multi_reduction <add>, %18, %cst_24 [1] : vector<4x8x128xf32> to vector<4x128xf32>
    %cst_25 = arith.constant 9.99999997E-7 : f32
    %20 = vector.broadcast %cst_25 : f32 to vector<4x1xf32>
    %21 = arith.addf %17, %20 : vector<4x1xf32>
    %22 = tpu.reciprocal %21 {approx = true} : vector<4x1xf32> -> vector<4x1xf32>
    %23 = vector.broadcast %22 : vector<4x1xf32> to vector<4x128xf32>
    %24 = arith.mulf %19, %23 : vector<4x128xf32>
    %c0_26 = arith.constant 0 : index
    %c0_27 = arith.constant 0 : index
    %25 = vector.load %arg6[%c0_26, %c0_27] : memref<128x640xbf16, #tpu.memory_space<vmem>>, vector<128x640xbf16>
    %26 = arith.truncf %5 : vector<32x128xf32> to vector<32x128xbf16>
    %cst_28 = arith.constant dense<0.000000e+00> : vector<32x640xf32>
    %27 = tpu.matmul %26, %25, %cst_28 {dimension_numbers = #tpu.dot_dimension_numbers<[1], [0], [0], [1], [0, 0, 1, 1], [], []>} : vector<32x128xbf16>, vector<128x640xbf16>, vector<32x640xf32> -> vector<32x640xf32>
    %28 = vector.broadcast %11 : vector<1x640xf32> to vector<32x640xf32>
    %29 = arith.addf %27, %28 : vector<32x640xf32>
    %30 = vector.extract_strided_slice %29 {offsets = [0, 0], sizes = [32, 128], strides = [1, 1]} : vector<32x640xf32> to vector<32x128xf32>
    %31 = vector.extract_strided_slice %29 {offsets = [0, 128], sizes = [32, 128], strides = [1, 1]} : vector<32x640xf32> to vector<32x128xf32>
    %32 = arith.truncf %30 : vector<32x128xf32> to vector<32x128xbf16>
    %cst_29 = arith.constant dense<0.000000e+00> : vector<32x128xf32>
    %33 = tpu.matmul %1, %32, %cst_29 {dimension_numbers = #tpu.dot_dimension_numbers<[1], [0], [0], [1], [0, 0, 1, 1], [], []>} : vector<32x32xbf16>, vector<32x128xbf16>, vector<32x128xf32> -> vector<32x128xf32>
    %34 = vector.broadcast %12 : vector<1x128xf32> to vector<32x128xf32>
    %35 = arith.addf %33, %34 : vector<32x128xf32>
    %36 = arith.truncf %31 : vector<32x128xf32> to vector<32x128xbf16>
    %cst_30 = arith.constant dense<0.000000e+00> : vector<32x128xf32>
    %37 = tpu.matmul %3, %36, %cst_30 {dimension_numbers = #tpu.dot_dimension_numbers<[1], [0], [0], [1], [0, 0, 1, 1], [], []>} : vector<32x32xbf16>, vector<32x128xbf16>, vector<32x128xf32> -> vector<32x128xf32>
    %38 = vector.broadcast %13 : vector<1x128xf32> to vector<32x128xf32>
    %39 = arith.addf %37, %38 : vector<32x128xf32>
    %c0_31 = arith.constant 0 : index
    %c0_32 = arith.constant 0 : index
    %40 = vector.load %arg10[%c0_31, %c0_32] : memref<128x384xbf16, #tpu.memory_space<vmem>>, vector<128x384xbf16>
    %41 = arith.truncf %35 : vector<32x128xf32> to vector<32x128xbf16>
    %cst_33 = arith.constant dense<0.000000e+00> : vector<32x384xf32>
    %42 = tpu.matmul %41, %40, %cst_33 {dimension_numbers = #tpu.dot_dimension_numbers<[1], [0], [0], [1], [0, 0, 1, 1], [], []>} : vector<32x128xbf16>, vector<128x384xbf16>, vector<32x384xf32> -> vector<32x384xf32>
    %c0_34 = arith.constant 0 : index
    %c0_35 = arith.constant 0 : index
    %43 = vector.load %arg11[%c0_34, %c0_35] : memref<128x384xbf16, #tpu.memory_space<vmem>>, vector<128x384xbf16>
    %44 = arith.truncf %39 : vector<32x128xf32> to vector<32x128xbf16>
    %cst_36 = arith.constant dense<0.000000e+00> : vector<32x384xf32>
    %45 = tpu.matmul %44, %43, %cst_36 {dimension_numbers = #tpu.dot_dimension_numbers<[1], [0], [0], [1], [0, 0, 1, 1], [], []>} : vector<32x128xbf16>, vector<128x384xbf16>, vector<32x384xf32> -> vector<32x384xf32>
    %46 = arith.addf %42, %45 : vector<32x384xf32>
    %47 = vector.broadcast %14 : vector<1x384xf32> to vector<32x384xf32>
    %48 = arith.addf %46, %47 : vector<32x384xf32>
    %49 = vector.extract_strided_slice %48 {offsets = [0, 0], sizes = [32, 128], strides = [1, 1]} : vector<32x384xf32> to vector<32x128xf32>
    %50 = vector.extract_strided_slice %29 {offsets = [0, 256], sizes = [32, 128], strides = [1, 1]} : vector<32x640xf32> to vector<32x128xf32>
    %51 = arith.addf %49, %50 : vector<32x128xf32>
    %52 = arith.negf %51 : vector<32x128xf32>
    %53 = math.exp %52 : vector<32x128xf32>
    %cst_37 = arith.constant 1.000000e+00 : f32
    %54 = vector.broadcast %cst_37 : f32 to vector<32x128xf32>
    %55 = arith.addf %54, %53 : vector<32x128xf32>
    %56 = arith.divf %54, %55 : vector<32x128xf32>
    %57 = vector.extract_strided_slice %48 {offsets = [0, 128], sizes = [32, 128], strides = [1, 1]} : vector<32x384xf32> to vector<32x128xf32>
    %58 = vector.extract_strided_slice %29 {offsets = [0, 384], sizes = [32, 128], strides = [1, 1]} : vector<32x640xf32> to vector<32x128xf32>
    %59 = arith.addf %57, %58 : vector<32x128xf32>
    %60 = arith.negf %59 : vector<32x128xf32>
    %61 = math.exp %60 : vector<32x128xf32>
    %cst_38 = arith.constant 1.000000e+00 : f32
    %62 = vector.broadcast %cst_38 : f32 to vector<32x128xf32>
    %63 = arith.addf %62, %61 : vector<32x128xf32>
    %64 = arith.divf %62, %63 : vector<32x128xf32>
    %65 = vector.extract_strided_slice %48 {offsets = [0, 256], sizes = [32, 128], strides = [1, 1]} : vector<32x384xf32> to vector<32x128xf32>
    %66 = vector.extract_strided_slice %29 {offsets = [0, 512], sizes = [32, 128], strides = [1, 1]} : vector<32x640xf32> to vector<32x128xf32>
    %67 = arith.mulf %56, %66 : vector<32x128xf32>
    %68 = arith.addf %65, %67 : vector<32x128xf32>
    %69 = math.tanh %68 : vector<32x128xf32>
    %70 = arith.subf %5, %69 : vector<32x128xf32>
    %71 = arith.mulf %64, %70 : vector<32x128xf32>
    %72 = arith.addf %69, %71 : vector<32x128xf32>
    %c0_39 = arith.constant 0 : index
    %c0_40 = arith.constant 0 : index
    %73 = vector.load %arg13[%c0_39, %c0_40] : memref<128x256xbf16, #tpu.memory_space<vmem>>, vector<128x256xbf16>
    %74 = arith.truncf %24 : vector<4x128xf32> to vector<4x128xbf16>
    %cst_41 = arith.constant dense<0.000000e+00> : vector<4x256xf32>
    %75 = tpu.matmul %74, %73, %cst_41 {dimension_numbers = #tpu.dot_dimension_numbers<[1], [0], [0], [1], [0, 0, 1, 1], [], []>} : vector<4x128xbf16>, vector<128x256xbf16>, vector<4x256xf32> -> vector<4x256xf32>
    %76 = vector.broadcast %15 : vector<1x256xf32> to vector<4x256xf32>
    %77 = arith.addf %75, %76 : vector<4x256xf32>
    %78 = vector.extract_strided_slice %77 {offsets = [0, 0], sizes = [4, 128], strides = [1, 1]} : vector<4x256xf32> to vector<4x128xf32>
    %79 = vector.shape_cast %78 : vector<4x128xf32> to vector<4x1x128xf32>
    %80 = vector.shape_cast %79 : vector<4x1x128xf32> to vector<4x1x128xf32>
    %81 = vector.broadcast %80 : vector<4x1x128xf32> to vector<4x8x128xf32>
    %82 = vector.shape_cast %81 : vector<4x8x128xf32> to vector<32x128xf32>
    %83 = arith.mulf %72, %82 : vector<32x128xf32>
    %cst_42 = arith.constant dense<0.000000e+00> : vector<32xf32>
    %84 = vector.multi_reduction <add>, %83, %cst_42 [1] : vector<32x128xf32> to vector<32xf32>
    %85 = vector.shape_cast %84 : vector<32xf32> to vector<32x1xf32>
    %cst_43 = arith.constant 0.0883883461 : f32
    %86 = vector.broadcast %cst_43 : f32 to vector<32x1xf32>
    %87 = arith.mulf %85, %86 : vector<32x1xf32>
    %cst_44 = arith.constant -1.000000e+30 : f32
    %88 = vector.shape_cast %87 : vector<32x1xf32> to vector<32x1xf32>
    %89 = vector.broadcast %88 : vector<32x1xf32> to vector<32x4xf32>
    %90 = vector.broadcast %cst_44 : f32 to vector<32x4xf32>
    %91 = arith.select %10, %89, %90 : vector<32x4xi1>, vector<32x4xf32>
    %cst_45 = arith.constant dense<0xFF800000> : vector<4xf32>
    %92 = vector.multi_reduction <maximumf>, %91, %cst_45 [0] : vector<32x4xf32> to vector<4xf32>
    %93 = vector.shape_cast %92 : vector<4xf32> to vector<1x4xf32>
    %94 = vector.broadcast %93 : vector<1x4xf32> to vector<32x4xf32>
    %95 = arith.subf %91, %94 : vector<32x4xf32>
    %96 = math.exp %95 : vector<32x4xf32>
    %cst_46 = arith.constant dense<0.000000e+00> : vector<4xf32>
    %97 = vector.multi_reduction <add>, %96, %cst_46 [0] : vector<32x4xf32> to vector<4xf32>
    %98 = vector.shape_cast %97 : vector<4xf32> to vector<1x4xf32>
    %99 = tpu.reciprocal %98 {approx = true} : vector<1x4xf32> -> vector<1x4xf32>
    %100 = vector.broadcast %99 : vector<1x4xf32> to vector<32x4xf32>
    %101 = arith.mulf %96, %100 : vector<32x4xf32>
    %cst_47 = arith.constant dense<0.000000e+00> : vector<32xf32>
    %102 = vector.multi_reduction <add>, %101, %cst_47 [1] : vector<32x4xf32> to vector<32xf32>
    %103 = vector.shape_cast %102 : vector<32xf32> to vector<32x1xf32>
    %104 = vector.shape_cast %24 : vector<4x128xf32> to vector<4x1x128xf32>
    %105 = vector.shape_cast %104 : vector<4x1x128xf32> to vector<4x1x128xf32>
    %106 = vector.broadcast %105 : vector<4x1x128xf32> to vector<4x8x128xf32>
    %107 = vector.shape_cast %106 : vector<4x8x128xf32> to vector<32x128xf32>
    %cst_48 = arith.constant 1.000000e+00 : f32
    %108 = vector.broadcast %cst_48 : f32 to vector<32x1xf32>
    %109 = arith.subf %108, %103 : vector<32x1xf32>
    %110 = vector.broadcast %109 : vector<32x1xf32> to vector<32x128xf32>
    %111 = arith.mulf %110, %72 : vector<32x128xf32>
    %112 = vector.broadcast %103 : vector<32x1xf32> to vector<32x128xf32>
    %113 = arith.mulf %112, %107 : vector<32x128xf32>
    %114 = arith.addf %111, %113 : vector<32x128xf32>
    %115 = vector.extract_strided_slice %77 {offsets = [0, 128], sizes = [4, 128], strides = [1, 1]} : vector<4x256xf32> to vector<4x128xf32>
    %116 = vector.shape_cast %115 : vector<4x128xf32> to vector<4x1x128xf32>
    %117 = vector.shape_cast %116 : vector<4x1x128xf32> to vector<4x1x128xf32>
    %118 = vector.broadcast %117 : vector<4x1x128xf32> to vector<4x8x128xf32>
    %119 = vector.shape_cast %118 : vector<4x8x128xf32> to vector<32x128xf32>
    %120 = arith.mulf %114, %119 : vector<32x128xf32>
    %cst_49 = arith.constant dense<0.000000e+00> : vector<32xf32>
    %121 = vector.multi_reduction <add>, %120, %cst_49 [1] : vector<32x128xf32> to vector<32xf32>
    %122 = vector.shape_cast %121 : vector<32xf32> to vector<32x1xf32>
    %cst_50 = arith.constant 0.0883883461 : f32
    %123 = vector.broadcast %cst_50 : f32 to vector<32x1xf32>
    %124 = arith.mulf %122, %123 : vector<32x1xf32>
    %cst_51 = arith.constant -1.000000e+30 : f32
    %125 = vector.shape_cast %124 : vector<32x1xf32> to vector<32x1xf32>
    %126 = vector.broadcast %125 : vector<32x1xf32> to vector<32x4xf32>
    %127 = vector.broadcast %cst_51 : f32 to vector<32x4xf32>
    %128 = arith.select %10, %126, %127 : vector<32x4xi1>, vector<32x4xf32>
    %cst_52 = arith.constant dense<0xFF800000> : vector<4xf32>
    %129 = vector.multi_reduction <maximumf>, %128, %cst_52 [0] : vector<32x4xf32> to vector<4xf32>
    %130 = vector.shape_cast %129 : vector<4xf32> to vector<1x4xf32>
    %131 = vector.broadcast %130 : vector<1x4xf32> to vector<32x4xf32>
    %132 = arith.subf %128, %131 : vector<32x4xf32>
    %133 = math.exp %132 : vector<32x4xf32>
    %cst_53 = arith.constant dense<0.000000e+00> : vector<4xf32>
    %134 = vector.multi_reduction <add>, %133, %cst_53 [0] : vector<32x4xf32> to vector<4xf32>
    %135 = vector.shape_cast %134 : vector<4xf32> to vector<1x4xf32>
    %136 = tpu.reciprocal %135 {approx = true} : vector<1x4xf32> -> vector<1x4xf32>
    %137 = vector.broadcast %136 : vector<1x4xf32> to vector<32x4xf32>
    %138 = arith.mulf %133, %137 : vector<32x4xf32>
    %cst_54 = arith.constant dense<0.000000e+00> : vector<32xf32>
    %139 = vector.multi_reduction <add>, %138, %cst_54 [1] : vector<32x4xf32> to vector<32xf32>
    %140 = vector.shape_cast %139 : vector<32xf32> to vector<32x1xf32>
    %141 = vector.broadcast %140 : vector<32x1xf32> to vector<32x128xf32>
    %142 = arith.mulf %141, %114 : vector<32x128xf32>
    %143 = vector.shape_cast %142 : vector<32x128xf32> to vector<4x8x128xf32>
    %cst_55 = arith.constant dense<0.000000e+00> : vector<4x128xf32>
    %144 = vector.multi_reduction <add>, %143, %cst_55 [1] : vector<4x8x128xf32> to vector<4x128xf32>
    %c0_56 = arith.constant 0 : index
    %c0_57 = arith.constant 0 : index
    %145 = vector.load %arg15[%c0_56, %c0_57] : memref<128x128xbf16, #tpu.memory_space<vmem>>, vector<128x128xbf16>
    %146 = arith.truncf %5 : vector<32x128xf32> to vector<32x128xbf16>
    %cst_58 = arith.constant dense<0.000000e+00> : vector<32x128xf32>
    %147 = tpu.matmul %146, %145, %cst_58 {dimension_numbers = #tpu.dot_dimension_numbers<[1], [0], [0], [1], [0, 0, 1, 1], [], []>} : vector<32x128xbf16>, vector<128x128xbf16>, vector<32x128xf32> -> vector<32x128xf32>
    %c0_59 = arith.constant 0 : index
    %c0_60 = arith.constant 0 : index
    %148 = vector.load %arg16[%c0_59, %c0_60] : memref<128x128xbf16, #tpu.memory_space<vmem>>, vector<128x128xbf16>
    %149 = arith.truncf %114 : vector<32x128xf32> to vector<32x128xbf16>
    %cst_61 = arith.constant dense<0.000000e+00> : vector<32x128xf32>
    %150 = tpu.matmul %149, %148, %cst_61 {dimension_numbers = #tpu.dot_dimension_numbers<[1], [0], [0], [1], [0, 0, 1, 1], [], []>} : vector<32x128xbf16>, vector<128x128xbf16>, vector<32x128xf32> -> vector<32x128xf32>
    %151 = arith.addf %147, %150 : vector<32x128xf32>
    %c0_62 = arith.constant 0 : index
    %c0_63 = arith.constant 0 : index
    %152 = vector.load %arg17[%c0_62, %c0_63] : memref<1x128xf32, #tpu.memory_space<vmem>>, vector<1x128xf32>
    %153 = vector.broadcast %152 : vector<1x128xf32> to vector<32x128xf32>
    %154 = arith.addf %151, %153 : vector<32x128xf32>
    %155 = arith.negf %154 : vector<32x128xf32>
    %156 = math.exp %155 : vector<32x128xf32>
    %cst_64 = arith.constant 1.000000e+00 : f32
    %157 = vector.broadcast %cst_64 : f32 to vector<32x128xf32>
    %158 = arith.addf %157, %156 : vector<32x128xf32>
    %159 = arith.divf %157, %158 : vector<32x128xf32>
    %160 = arith.mulf %159, %5 : vector<32x128xf32>
    %cst_65 = arith.constant 1.000000e+00 : f32
    %161 = vector.broadcast %cst_65 : f32 to vector<32x128xf32>
    %162 = arith.subf %161, %159 : vector<32x128xf32>
    %163 = arith.mulf %162, %114 : vector<32x128xf32>
    %164 = arith.addf %160, %163 : vector<32x128xf32>
    %c0_66 = arith.constant 0 : index
    %c0_67 = arith.constant 0 : index
    %c0_68 = arith.constant 0 : index
    %165 = vector.load %arg18[%c0_66, %c0_67, %c0_68] : memref<1x32x128xf32, #tpu.memory_space<vmem>>, vector<1x32x128xf32>
    %166 = vector.shape_cast %165 : vector<1x32x128xf32> to vector<32x128xf32>
    %167 = vector.shape_cast %164 : vector<32x128xf32> to vector<1x32x128xf32>
    tpu.vector_store %arg18[%c0_66, %c0_67, %c0_68], %167 {strides = array<i32>} : memref<1x32x128xf32, #tpu.memory_space<vmem>>, vector<1x32x128xf32>,
    %c0_69 = arith.constant 0 : index
    %c0_70 = arith.constant 0 : index
    %c0_71 = arith.constant 0 : index
    %168 = vector.load %arg19[%c0_69, %c0_70, %c0_71] : memref<1x4x128xf32, #tpu.memory_space<vmem>>, vector<1x4x128xf32>
    %169 = vector.shape_cast %168 : vector<1x4x128xf32> to vector<4x128xf32>
    %170 = vector.shape_cast %144 : vector<4x128xf32> to vector<1x4x128xf32>
    tpu.vector_store %arg19[%c0_69, %c0_70, %c0_71], %170 {strides = array<i32>} : memref<1x4x128xf32, #tpu.memory_space<vmem>>, vector<1x4x128xf32>,
    return
  }
  func.func @transform_0(%arg0: i32) -> (i32, i32, i32) {
    %c0_i32 = arith.constant 0 : i32
    %c0_i32_0 = arith.constant 0 : i32
    %c0_i32_1 = arith.constant 0 : i32
    return %arg0, %c0_i32, %c0_i32_0 : i32, i32, i32
  }
  func.func @transform_1(%arg0: i32) -> (i32, i32, i32) {
    %c0_i32 = arith.constant 0 : i32
    %c0_i32_0 = arith.constant 0 : i32
    %c0_i32_1 = arith.constant 0 : i32
    return %arg0, %c0_i32, %c0_i32_0 : i32, i32, i32
  }
  func.func @transform_2(%arg0: i32) -> (i32, i32, i32) {
    %c0_i32 = arith.constant 0 : i32
    %c0_i32_0 = arith.constant 0 : i32
    %c0_i32_1 = arith.constant 0 : i32
    return %arg0, %c0_i32, %c0_i32_0 : i32, i32, i32
  }
  func.func @transform_3(%arg0: i32) -> (i32, i32, i32) {
    %c0_i32 = arith.constant 0 : i32
    %c0_i32_0 = arith.constant 0 : i32
    %c0_i32_1 = arith.constant 0 : i32
    return %arg0, %c0_i32, %c0_i32_0 : i32, i32, i32
  }
  func.func @transform_4(%arg0: i32) -> (i32, i32) {
    %c0_i32 = arith.constant 0 : i32
    %c0_i32_0 = arith.constant 0 : i32
    %c0_i32_1 = arith.constant 0 : i32
    return %c0_i32, %c0_i32_0 : i32, i32
  }
  func.func @transform_5(%arg0: i32) -> (i32, i32) {
    %c0_i32 = arith.constant 0 : i32
    %c0_i32_0 = arith.constant 0 : i32
    %c0_i32_1 = arith.constant 0 : i32
    return %c0_i32, %c0_i32_0 : i32, i32
  }
  func.func @transform_6(%arg0: i32) -> (i32, i32) {
    %c0_i32 = arith.constant 0 : i32
    %c0_i32_0 = arith.constant 0 : i32
    %c0_i32_1 = arith.constant 0 : i32
    return %c0_i32, %c0_i32_0 : i32, i32
  }
  func.func @transform_7(%arg0: i32) -> (i32, i32) {
    %c0_i32 = arith.constant 0 : i32
    %c0_i32_0 = arith.constant 0 : i32
    %c0_i32_1 = arith.constant 0 : i32
    return %c0_i32, %c0_i32_0 : i32, i32
  }
  func.func @transform_8(%arg0: i32) -> (i32, i32) {
    %c0_i32 = arith.constant 0 : i32
    %c0_i32_0 = arith.constant 0 : i32
    %c0_i32_1 = arith.constant 0 : i32
    return %c0_i32, %c0_i32_0 : i32, i32
  }
  func.func @transform_9(%arg0: i32) -> (i32, i32) {
    %c0_i32 = arith.constant 0 : i32
    %c0_i32_0 = arith.constant 0 : i32
    %c0_i32_1 = arith.constant 0 : i32
    return %c0_i32, %c0_i32_0 : i32, i32
  }
  func.func @transform_10(%arg0: i32) -> (i32, i32) {
    %c0_i32 = arith.constant 0 : i32
    %c0_i32_0 = arith.constant 0 : i32
    %c0_i32_1 = arith.constant 0 : i32
    return %c0_i32, %c0_i32_0 : i32, i32
  }
  func.func @transform_11(%arg0: i32) -> (i32, i32) {
    %c0_i32 = arith.constant 0 : i32
    %c0_i32_0 = arith.constant 0 : i32
    %c0_i32_1 = arith.constant 0 : i32
    return %c0_i32, %c0_i32_0 : i32, i32
  }
  func.func @transform_12(%arg0: i32) -> (i32, i32) {
    %c0_i32 = arith.constant 0 : i32
    %c0_i32_0 = arith.constant 0 : i32
    %c0_i32_1 = arith.constant 0 : i32
    return %c0_i32, %c0_i32_0 : i32, i32
  }
  func.func @transform_13(%arg0: i32) -> (i32, i32) {
    %c0_i32 = arith.constant 0 : i32
    %c0_i32_0 = arith.constant 0 : i32
    %c0_i32_1 = arith.constant 0 : i32
    return %c0_i32, %c0_i32_0 : i32, i32
  }
  func.func @transform_14(%arg0: i32) -> (i32, i32) {
    %c0_i32 = arith.constant 0 : i32
    %c0_i32_0 = arith.constant 0 : i32
    %c0_i32_1 = arith.constant 0 : i32
    return %c0_i32, %c0_i32_0 : i32, i32
  }
  func.func @transform_15(%arg0: i32) -> (i32, i32) {
    %c0_i32 = arith.constant 0 : i32
    %c0_i32_0 = arith.constant 0 : i32
    %c0_i32_1 = arith.constant 0 : i32
    return %c0_i32, %c0_i32_0 : i32, i32
  }
  func.func @transform_16(%arg0: i32) -> (i32, i32) {
    %c0_i32 = arith.constant 0 : i32
    %c0_i32_0 = arith.constant 0 : i32
    %c0_i32_1 = arith.constant 0 : i32
    return %c0_i32, %c0_i32_0 : i32, i32
  }
  func.func @transform_17(%arg0: i32) -> (i32, i32, i32) {
    %c0_i32 = arith.constant 0 : i32
    %c0_i32_0 = arith.constant 0 : i32
    %c0_i32_1 = arith.constant 0 : i32
    return %arg0, %c0_i32, %c0_i32_0 : i32, i32, i32
  }
  func.func @transform_18(%arg0: i32) -> (i32, i32, i32) {
    %c0_i32 = arith.constant 0 : i32
    %c0_i32_0 = arith.constant 0 : i32
    %c0_i32_1 = arith.constant 0 : i32
    return %arg0, %c0_i32, %c0_i32_0 : i32, i32, i32
  }
}

</mosaic_0001>

<bundles_post_ra>
// kernel: tpu_custom_call.1
= control target key start
LH: loop header
LB: loop body
LE: loop exit
PB: predicated region body
PF: predicated region fallthrough
CT: control target
= control target key end

     0   :  { %s3824_s0 = inlined_call_operand.vmem [shape: bf16[1,32,32], index: 0, kind: input, shape index: {}]   ;;  %s3825_s1 = inlined_call_operand.hbm [shape: bf16[1,32,32], index: 1, kind: input, shape index: {}]   ;;  %s3826_s2 = inlined_call_operand.hbm [shape: f32[1,32,128], index: 2, kind: input, shape index: {}]   ;;  %s3827_s3 = inlined_call_operand.vmem [shape: f32[1,4,8], index: 3, kind: input, shape index: {}]   ;;  %s3828_s4 = inlined_call_operand.vmem [shape: f32[32,4], index: 4, kind: input, shape index: {}]   ;;  %s3829_s5 = inlined_call_operand.hbm [shape: bf16[128,640], index: 5, kind: input, shape index: {}]   ;;  %s3830_s6 = inlined_call_operand.vmem [shape: f32[1,640], index: 6, kind: input, shape index: {}]   ;;  %s3831_s7 = inlined_call_operand.hbm [shape: f32[1,128], index: 7, kind: input, shape index: {}]   ;;  %s3832_s8 = inlined_call_operand.hbm [shape: f32[1,128], index: 8, kind: input, shape index: {}]   ;;  %s3833_s9 = inlined_call_operand.hbm [shape: bf16[128,384], index: 9, kind: input, shape index: {}]   ;;  %s3834_s10 = inlined_call_operand.hbm [shape: bf16[128,384], index: 10, kind: input, shape index: {}]   ;;  %s3835_s11 = inlined_call_operand.hbm [shape: f32[1,384], index: 11, kind: input, shape index: {}]   ;;  %s3836_s12 = inlined_call_operand.hbm [shape: bf16[128,256], index: 12, kind: input, shape index: {}]   ;;  %s3837_s13 = inlined_call_operand.hbm [shape: f32[1,256], index: 13, kind: input, shape index: {}]   ;;  %s3838_s14 = inlined_call_operand.vmem [shape: bf16[128,128], index: 14, kind: input, shape index: {}]   ;;  %s3839_s15 = inlined_call_operand.hbm [shape: bf16[128,128], index: 15, kind: input, shape index: {}]   ;;  %s3840_s16 = inlined_call_operand.vmem [shape: f32[1,128], index: 16, kind: input, shape index: {}]   ;;  %s3841_s17 = inlined_call_operand.hbm [shape: f32[1,32,128], index: 17, kind: output, shape index: {0}]   ;;  %s3842_s18 = inlined_call_operand.hbm [shape: f32[1,4,128], index: 18, kind: output, shape index: {1}]  }
   0x1   :  { %3849 = sst [smem:[#allocation31_spill]] %s3824_s0 }
   0x2   :  { %3850 = sst [smem:[#allocation32_spill]] %s3825_s1 }
   0x3   :  { %3851 = sst [smem:[#allocation33_spill]] %s3826_s2 }
   0x4   :  { %3852 = sst [smem:[#allocation34_spill]] %s3841_s17 }
   0x5   :  { %3853 = sst [smem:[#allocation35_spill]] %s3842_s18 }
   0x6   :  { %24 = vsyncpa [#allocation3], 0 }
   0x7   :  { %25 = vsyncpa [#allocation6], 0 }
   0x8   :  { %26 = vsyncpa [#allocation9], 0 }
   0x9   :  { %27 = vsyncpa [#allocation12], 0 }
   0xa   :  { %28 = vsyncpa [#allocation15], 0 }
   0xb   :  { %29 = vsyncpa [#allocation18], 0 }
   0xc   :  { %30 = vsyncpa [#allocation4], 0 }
   0xd   :  { %31 = vsyncpa [#allocation22], 0  ;;  %s3220_s27 = smov [#allocation5]   ;;  %s3854_s0 = sld [smem:[#allocation33_spill]] }
   0xe   :  { %s51_s28 = sshll.u32 %s3220_s27, 4  ;;  %s52_s28 = int_to_ptr.vmem [resolvable:$true] %s51_s28 }
  0x13   :  { %s2918_s19 = scalar_lea.hbm %s3854_s0, 512 }
  0x14   :  { %p2919_p0 = scmp.ne.s32.totalorder %s3854_s0, %s2918_s19  ;;  %p2922_p1 = scmp.lt.u32.totalorder %s2918_s19, %s3854_s0 }
  0x16   :  { %p2924_p2 = pnand %p2922_p1, %p2919_p0 }
  0x18   :  { %2927 = shalt.err (!%p2924_p2)
}
  0x19   :  { %s2928_s2 = scalar_lea.vmem %s52_s28, 512  ;;  %p2933_p4 = scmp.lt.s32.totalorder %s52_s28, %s52_s28 }
  0x1a   :  { %p2929_p3 = scmp.ne.s32.totalorder %s52_s28, %s2928_s2  ;;  %p2934_p5 = scmp.lt.s32.totalorder %s2928_s2, %s2928_s2 }
  0x1c   :  { %p2935_p6 = por %p2934_p5, %p2933_p4 }
  0x1e   :  { %p2936_p7 = pnand %p2935_p6, %p2929_p3 }
  0x20   :  { %2939 = shalt.err (!%p2936_p7)
}
  0x21   :  { %s3221_s23 = smov 128   ;;  %s3222_s24 = smov 8  }
  0x22   :  { %57 = dma.hbm_to_vmem [thread:$0]  %s3854_s0, 512, %s52_s28, [#allocation6], %s3221_s23, %s3221_s23, %s3222_s24  }
  0x23   :  { %s3223_s27 = smov [#allocation8]   ;;  %s3224_s30 = smov [#allocation11]  }
  0x24   :  { %s82_s29 = sshll.u32 %s3223_s27, 4  ;;  %s101_s19 = sshll.u32 %s3224_s30, 4  ;;  %s83_s29 = int_to_ptr.vmem [resolvable:$true] %s82_s29  ;;  %s102_s19 = int_to_ptr.vmem [resolvable:$true] %s101_s19 }
  0x25   :  { %s2940_s21 = scalar_lea.hbm %s3831_s7, 16 }
  0x26   :  { %p2941_p8 = scmp.ne.s32.totalorder %s3831_s7, %s2940_s21  ;;  %p2944_p9 = scmp.lt.u32.totalorder %s2940_s21, %s3831_s7 }
  0x28   :  { %p2946_p10 = pnand %p2944_p9, %p2941_p8 }
  0x2a   :  { %2949 = shalt.err (!%p2946_p10)
}
  0x2b   :  { %s2950_s28 = scalar_lea.vmem %s83_s29, 16  ;;  %s2954_s0 = scalar_lea.vmem %s83_s29, 32 }
  0x2c   :  { %p2951_p11 = scmp.ne.s32.totalorder %s83_s29, %s2950_s28  ;;  %p2955_p12 = scmp.lt.s32.totalorder %s83_s29, %s83_s29 }
  0x2d   :  { %p2956_p13 = scmp.lt.s32.totalorder %s2954_s0, %s2950_s28 }
  0x2f   :  { %p2957_p0 = por %p2956_p13, %p2955_p12 }
  0x31   :  { %p2958_p1 = pnand %p2957_p0, %p2951_p11 }
  0x33   :  { %2961 = shalt.err (!%p2958_p1)
}
  0x34   :  { %85 = dma.hbm_to_vmem [thread:$0]  %s3831_s7, 16, %s83_s29, [#allocation9]  }
  0x35   :  { %s2962_s17 = scalar_lea.hbm %s3833_s9, 3072 }
  0x36   :  { %p2963_p2 = scmp.ne.s32.totalorder %s3833_s9, %s2962_s17  ;;  %p2966_p3 = scmp.lt.u32.totalorder %s2962_s17, %s3833_s9 }
  0x38   :  { %p2968_p4 = pnand %p2966_p3, %p2963_p2 }
  0x3a   :  { %2971 = shalt.err (!%p2968_p4)
}
  0x3b   :  { %s2972_s22 = scalar_lea.vmem %s102_s19, 3072  ;;  %p2977_p6 = scmp.lt.s32.totalorder %s102_s19, %s102_s19 }
  0x3c   :  { %p2973_p5 = scmp.ne.s32.totalorder %s102_s19, %s2972_s22  ;;  %p2978_p7 = scmp.lt.s32.totalorder %s2972_s22, %s2972_s22 }
  0x3e   :  { %p2979_p8 = por %p2978_p7, %p2977_p6 }
  0x40   :  { %p2980_p9 = pnand %p2979_p8, %p2973_p5 }
  0x42   :  { %2983 = shalt.err (!%p2980_p9)
}
  0x43   :  { %s3225_s7 = smov 192   ;;  %s3226_s29 = smov 12  }
  0x44   :  { %107 = dma.hbm_to_vmem [thread:$0]  %s3833_s9, 3072, %s102_s19, [#allocation12], %s3225_s7, %s3225_s7, %s3226_s29  }
  0x45   :  { %s3227_s0 = smov [#allocation14]   ;;  %s3228_s26 = smov [#allocation17]  }
  0x46   :  { %s126_s25 = sshll.u32 %s3227_s0, 4  ;;  %s148_s27 = sshll.u32 %s3228_s26, 4  ;;  %s127_s25 = int_to_ptr.vmem [resolvable:$true] %s126_s25  ;;  %s149_s27 = int_to_ptr.vmem [resolvable:$true] %s148_s27 }
  0x47   :  { %s2984_s18 = scalar_lea.hbm %s3835_s11, 48 }
  0x48   :  { %p2985_p10 = scmp.ne.s32.totalorder %s3835_s11, %s2984_s18  ;;  %p2988_p11 = scmp.lt.u32.totalorder %s2984_s18, %s3835_s11 }
  0x4a   :  { %p2990_p12 = pnand %p2988_p11, %p2985_p10 }
  0x4c   :  { %2993 = shalt.err (!%p2990_p12)
}
  0x4d   :  { %s2994_s9 = scalar_lea.vmem %s127_s25, 48  ;;  %s2998_s19 = scalar_lea.vmem %s127_s25, 64 }
  0x4e   :  { %p2995_p13 = scmp.ne.s32.totalorder %s127_s25, %s2994_s9  ;;  %p2999_p0 = scmp.lt.s32.totalorder %s127_s25, %s127_s25 }
  0x4f   :  { %p3000_p1 = scmp.lt.s32.totalorder %s2998_s19, %s2994_s9 }
  0x51   :  { %p3001_p2 = por %p3000_p1, %p2999_p0 }
  0x53   :  { %p3002_p3 = pnand %p3001_p2, %p2995_p13 }
  0x55   :  { %3005 = shalt.err (!%p3002_p3)
}
  0x56   :  { %129 = dma.hbm_to_vmem [thread:$0]  %s3835_s11, 48, %s127_s25, [#allocation15]  }
  0x57   :  { %s3006_s30 = scalar_lea.hbm %s3837_s13, 32 }
  0x58   :  { %p3007_p4 = scmp.ne.s32.totalorder %s3837_s13, %s3006_s30  ;;  %p3010_p5 = scmp.lt.u32.totalorder %s3006_s30, %s3837_s13 }
  0x5a   :  { %p3012_p6 = pnand %p3010_p5, %p3007_p4 }
  0x5c   :  { %3015 = shalt.err (!%p3012_p6)
}
  0x5d   :  { %s3016_s21 = scalar_lea.vmem %s149_s27, 32  ;;  %p3021_p8 = scmp.lt.s32.totalorder %s149_s27, %s149_s27 }
  0x5e   :  { %p3017_p7 = scmp.ne.s32.totalorder %s149_s27, %s3016_s21  ;;  %p3022_p9 = scmp.lt.s32.totalorder %s3016_s21, %s3016_s21 }
  0x60   :  { %p3023_p10 = por %p3022_p9, %p3021_p8 }
  0x62   :  { %p3024_p11 = pnand %p3023_p10, %p3017_p7 }
  0x64   :  { %3027 = shalt.err (!%p3024_p11)
}
  0x65   :  { %151 = dma.hbm_to_vmem [thread:$0]  %s3837_s13, 32, %s149_s27, [#allocation18]  }
  0x66   :  { %s3229_s22 = smov [#allocation2]   ;;  %s3855_s28 = sld [smem:[#allocation32_spill]] }
  0x67   :  { %s39_s9 = sshll.u32 %s3229_s22, 4  ;;  %s40_s9 = int_to_ptr.vmem [resolvable:$true] %s39_s9 }
  0x6c   :  { %s3028_s0 = scalar_lea.hbm %s3855_s28, 256 }
  0x6d   :  { %p3029_p12 = scmp.ne.s32.totalorder %s3855_s28, %s3028_s0  ;;  %p3032_p13 = scmp.lt.u32.totalorder %s3028_s0, %s3855_s28 }
  0x6f   :  { %p3034_p0 = pnand %p3032_p13, %p3029_p12 }
  0x71   :  { %3037 = shalt.err (!%p3034_p0)
}
  0x72   :  { %s3038_s1 = scalar_lea.vmem %s40_s9, 256  ;;  %p3043_p2 = scmp.lt.s32.totalorder %s40_s9, %s40_s9 }
  0x73   :  { %p3039_p1 = scmp.ne.s32.totalorder %s40_s9, %s3038_s1  ;;  %p3044_p3 = scmp.lt.s32.totalorder %s3038_s1, %s3038_s1 }
  0x75   :  { %p3045_p4 = por %p3044_p3, %p3043_p2 }
  0x77   :  { %p3046_p5 = pnand %p3045_p4, %p3039_p1 }
  0x79   :  { %3049 = shalt.err (!%p3046_p5)
}
  0x7a   :  { %s3848_s13 = smov 64   ;;  %s3231_s27 = smov 4  }
  0x7b   :  { %45 = dma.hbm_to_vmem [thread:$0]  %s3855_s28, 256, %s40_s9, [#allocation3], %s3848_s13, %s3848_s13, %s3231_s27  }
  0x7c   :  { %s3232_s11 = smov [#allocation7]   ;;  %s3050_s2 = scalar_lea.hbm %s3829_s5, 5120 }
  0x7d   :  { %s67_s25 = sshll.u32 %s3232_s11, 4  ;;  %p3051_p6 = scmp.ne.s32.totalorder %s3829_s5, %s3050_s2  ;;  %s68_s25 = int_to_ptr.vmem [resolvable:$true] %s67_s25 }
  0x7e   :  { %p3054_p7 = scmp.lt.u32.totalorder %s3050_s2, %s3829_s5 }
  0x80   :  { %p3056_p8 = pnand %p3054_p7, %p3051_p6 }
  0x82   :  { %3059 = shalt.err (!%p3056_p8)
}
  0x83   :  { %s3060_s18 = scalar_lea.vmem %s68_s25, 5120  ;;  %p3065_p10 = scmp.lt.s32.totalorder %s68_s25, %s68_s25 }
  0x84   :  { %p3061_p9 = scmp.ne.s32.totalorder %s68_s25, %s3060_s18  ;;  %p3066_p11 = scmp.lt.s32.totalorder %s3060_s18, %s3060_s18 }
  0x86   :  { %p3067_p12 = por %p3066_p11, %p3065_p10 }
  0x88   :  { %p3068_p13 = pnand %p3067_p12, %p3061_p9 }
  0x8a   :  { %3071 = shalt.err (!%p3068_p13)
}
  0x8b   :  { %s3233_s9 = smov 320   ;;  %s3234_s28 = smov 20  }
  0x8c   :  { %73 = dma.hbm_to_vmem [thread:$0]  %s3829_s5, 5120, %s68_s25, [#allocation6], %s3233_s9, %s3233_s9, %s3234_s28  }
  0x8d   :  { %s3235_s21 = smov [#allocation10]   ;;  %s3236_s22 = smov [#allocation13]  }
  0x8e   :  { %s92_s11 = sshll.u32 %s3235_s21, 4  ;;  %s113_s19 = sshll.u32 %s3236_s22, 4  ;;  %s93_s11 = int_to_ptr.vmem [resolvable:$true] %s92_s11  ;;  %s114_s19 = int_to_ptr.vmem [resolvable:$true] %s113_s19 }
  0x8f   :  { %s3072_s26 = scalar_lea.hbm %s3832_s8, 16 }
  0x90   :  { %p3073_p0 = scmp.ne.s32.totalorder %s3832_s8, %s3072_s26  ;;  %p3076_p1 = scmp.lt.u32.totalorder %s3072_s26, %s3832_s8 }
  0x92   :  { %p3078_p2 = pnand %p3076_p1, %p3073_p0 }
  0x94   :  { %3081 = shalt.err (!%p3078_p2)
}
  0x95   :  { %s3082_s5 = scalar_lea.vmem %s93_s11, 16  ;;  %s3086_s25 = scalar_lea.vmem %s93_s11, 32 }
  0x96   :  { %p3083_p3 = scmp.ne.s32.totalorder %s93_s11, %s3082_s5  ;;  %p3087_p4 = scmp.lt.s32.totalorder %s93_s11, %s93_s11 }
  0x97   :  { %p3088_p5 = scmp.lt.s32.totalorder %s3086_s25, %s3082_s5 }
  0x99   :  { %p3089_p6 = por %p3088_p5, %p3087_p4 }
  0x9b   :  { %p3090_p7 = pnand %p3089_p6, %p3083_p3 }
  0x9d   :  { %3093 = shalt.err (!%p3090_p7)
}
  0x9e   :  { %95 = dma.hbm_to_vmem [thread:$0]  %s3832_s8, 16, %s93_s11, [#allocation9]  }
  0x9f   :  { %s3094_s13 = scalar_lea.hbm %s3834_s10, 3072 }
  0xa0   :  { %p3095_p8 = scmp.ne.s32.totalorder %s3834_s10, %s3094_s13  ;;  %p3098_p9 = scmp.lt.u32.totalorder %s3094_s13, %s3834_s10 }
  0xa2   :  { %p3100_p10 = pnand %p3098_p9, %p3095_p8 }
  0xa4   :  { %3103 = shalt.err (!%p3100_p10)
}
  0xa5   :  { %s3104_s26 = scalar_lea.vmem %s114_s19, 3072  ;;  %p3109_p12 = scmp.lt.s32.totalorder %s114_s19, %s114_s19 }
  0xa6   :  { %p3105_p11 = scmp.ne.s32.totalorder %s114_s19, %s3104_s26  ;;  %p3110_p13 = scmp.lt.s32.totalorder %s3104_s26, %s3104_s26 }
  0xa8   :  { %p3111_p0 = por %p3110_p13, %p3109_p12 }
  0xaa   :  { %p3112_p1 = pnand %p3111_p0, %p3105_p11 }
  0xac   :  { %3115 = shalt.err (!%p3112_p1)
}
  0xad   :  { %119 = dma.hbm_to_vmem [thread:$0]  %s3834_s10, 3072, %s114_s19, [#allocation12], %s3225_s7, %s3225_s7, %s3226_s29  }
  0xae   :  { %s3237_s30 = smov [#allocation16]   ;;  %s3238_s18 = smov [#allocation19]  }
  0xaf   :  { %s135_s17 = sshll.u32 %s3237_s30, 4  ;;  %s159_s5 = sshll.u32 %s3238_s18, 4  ;;  %s136_s17 = int_to_ptr.vmem [resolvable:$true] %s135_s17  ;;  %s160_s5 = int_to_ptr.vmem [resolvable:$true] %s159_s5 }
  0xb0   :  { %s3116_s28 = scalar_lea.hbm %s3836_s12, 2048 }
  0xb1   :  { %p3117_p2 = scmp.ne.s32.totalorder %s3836_s12, %s3116_s28  ;;  %p3120_p3 = scmp.lt.u32.totalorder %s3116_s28, %s3836_s12 }
  0xb3   :  { %p3122_p4 = pnand %p3120_p3, %p3117_p2 }
  0xb5   :  { %3125 = shalt.err (!%p3122_p4)
}
  0xb6   :  { %s3126_s10 = scalar_lea.vmem %s136_s17, 2048  ;;  %p3131_p6 = scmp.lt.s32.totalorder %s136_s17, %s136_s17 }
  0xb7   :  { %p3127_p5 = scmp.ne.s32.totalorder %s136_s17, %s3126_s10  ;;  %p3132_p7 = scmp.lt.s32.totalorder %s3126_s10, %s3126_s10 }
  0xb9   :  { %p3133_p8 = por %p3132_p7, %p3131_p6 }
  0xbb   :  { %p3134_p9 = pnand %p3133_p8, %p3127_p5 }
  0xbd   :  { %3137 = shalt.err (!%p3134_p9)
}
  0xbe   :  { %141 = dma.hbm_to_vmem [thread:$0]  %s3836_s12, 2048, %s136_s17, [#allocation15], %s3221_s23, %s3221_s23, %s3222_s24  }
  0xbf   :  { %s3138_s2 = scalar_lea.hbm %s3839_s15, 1024 }
  0xc0   :  { %p3139_p10 = scmp.ne.s32.totalorder %s3839_s15, %s3138_s2  ;;  %p3142_p11 = scmp.lt.u32.totalorder %s3138_s2, %s3839_s15 }
  0xc2   :  { %p3144_p12 = pnand %p3142_p11, %p3139_p10 }
  0xc4   :  { %3147 = shalt.err (!%p3144_p12)
}
  0xc5   :  { %s3148_s30 = scalar_lea.vmem %s160_s5, 1024  ;;  %p3153_p0 = scmp.lt.s32.totalorder %s160_s5, %s160_s5 }
  0xc6   :  { %p3149_p13 = scmp.ne.s32.totalorder %s160_s5, %s3148_s30  ;;  %p3154_p1 = scmp.lt.s32.totalorder %s3148_s30, %s3148_s30 }
  0xc8   :  { %p3155_p2 = por %p3154_p1, %p3153_p0 }
  0xca   :  { %p3156_p3 = pnand %p3155_p2, %p3149_p13 }
  0xcc   :  { %3159 = shalt.err (!%p3156_p3)
}
  0xcd   :  { %s3856_s12 = smov 64  }
  0xce   :  { %165 = dma.hbm_to_vmem [thread:$0]  %s3839_s15, 1024, %s160_s5, [#allocation18], %s3856_s12, %s3856_s12, %s3231_s27  }
  0xcf   :  { %3204 = dma.done.wait [#allocation3], 256  }
  0xd0   :  { %3205 = vsyncadd [#allocation3], 4294967040 }
  0xd1   :  { %3206 = dma.done.wait [#allocation6], 5632  }
  0xd2   :  { %3207 = vsyncadd [#allocation6], 4294961664 }
  0xd3   :  { %3208 = dma.done.wait [#allocation9], 32  }
  0xd4   :  { %3209 = vsyncadd [#allocation9], 4294967264 }
  0xd5   :  { %3210 = dma.done.wait [#allocation12], 6144  }
  0xd6   :  { %3211 = vsyncadd [#allocation12], 4294961152 }
  0xd7   :  { %3212 = dma.done.wait [#allocation15], 2096  }
  0xd8   :  { %3213 = vsyncadd [#allocation15], 4294965200 }
  0xd9   :  { %3214 = dma.done.wait [#allocation18], 1056  }
  0xda   :  { %3215 = vsyncadd [#allocation18], 4294966240  ;;  %v3239_v0 = vmov 0   ;;  %v2672_v1 = vld [vmem:[#allocation7 + $0x4] ss:$20 sps:$4 sm:$0xff]   ;;  %v3492_v27 = vld [vmem:[#allocation5 + $0x8] sm:$0xff]  ;;  %v321_v54 = vlaneseq }
  0xdb   :  { %586 = vmatprep.mubr.bf16.mxu0 %v3239_v0  ;;  %639 = vmatprep.mubr.bf16.mxu1 %v3239_v0  ;;  %v2674_v2 = vld [vmem:[#allocation7] ss:$20 sps:$4 sm:$0xff]   ;;  %v2677_v4 = vld [vmem:[#allocation7 + $0x28] ss:$20 sps:$4 sm:$0xff]   ;;  %v2680_v6 = vld [vmem:[#allocation7 + $0x50] ss:$20 sps:$4 sm:$0xff]  }
  0xdc   :  { %554 = vmatprep.subr.bf16.mxu0 %v2672_v1  ;;  %v2675_v3 = vld [vmem:[#allocation7 + $0x2c] ss:$20 sps:$4 sm:$0xff]   ;;  %v2678_v5 = vld [vmem:[#allocation7 + $0x54] ss:$20 sps:$4 sm:$0xff]   ;;  %v2681_v7 = vld [vmem:[#allocation7 + $0x7c] ss:$20 sps:$4 sm:$0xff]  }
  0xdd   :  { %555 = vmatpush1.bf16.msra.mxu0 %v2674_v2  ;;  %v2683_v8 = vld [vmem:[#allocation7 + $0x78] ss:$20 sps:$4 sm:$0xff]   ;;  %v2698_v11 = vld [vmem:[#allocation7 + $0x8] ss:$20 sps:$4 sm:$0xff]   ;;  %v2686_v12 = vld [vmem:[#allocation7 + $0xa0] ss:$20 sps:$4 sm:$0xff]  }
  0xde   :  { %556 = vmatprep.subr.bf16.mxu0 %v2675_v3  ;;  %v2684_v9 = vld [vmem:[#allocation7 + $0xa4] ss:$20 sps:$4 sm:$0xff]   ;;  %v2696_v10 = vld [vmem:[#allocation7 + $0xc] ss:$20 sps:$4 sm:$0xff]   ;;  %v2699_v13 = vld [vmem:[#allocation7 + $0x34] ss:$20 sps:$4 sm:$0xff]  }
  0xdf   :  { %v2687_v14 = vld [vmem:[#allocation7 + $0xcc] ss:$20 sps:$4 sm:$0xff]   ;;  %607 = vmatprep.subr.bf16.mxu1 %v2696_v10  ;;  %v2701_v15 = vld [vmem:[#allocation7 + $0x30] ss:$20 sps:$4 sm:$0xff]   ;;  %v2689_v17 = vld [vmem:[#allocation7 + $0xc8] ss:$20 sps:$4 sm:$0xff]  }
  0xe0   :  { %608 = vmatpush1.bf16.msra.mxu1 %v2698_v11  ;;  %v2702_v16 = vld [vmem:[#allocation7 + $0x5c] ss:$20 sps:$4 sm:$0xff]   ;;  %v2690_v18 = vld [vmem:[#allocation7 + $0xf4] ss:$20 sps:$4 sm:$0xff]   ;;  %v2704_v19 = vld [vmem:[#allocation7 + $0x58] ss:$20 sps:$4 sm:$0xff]  }
  0xe1   :  { %557 = vmatpush1.bf16.msra.mxu0 %v2677_v4  ;;  %609 = vmatprep.subr.bf16.mxu1 %v2699_v13  ;;  %v2705_v20 = vld [vmem:[#allocation7 + $0x84] ss:$20 sps:$4 sm:$0xff]   ;;  %v2693_v22 = vld [vmem:[#allocation7 + $0x11c] ss:$20 sps:$4 sm:$0xff]   ;;  %v2707_v23 = vld [vmem:[#allocation7 + $0x80] ss:$20 sps:$4 sm:$0xff]  }
  0xe2   :  { %558 = vmatprep.subr.bf16.mxu0 %v2678_v5  ;;  %v2692_v21 = vld [vmem:[#allocation7 + $0xf0] ss:$20 sps:$4 sm:$0xff]   ;;  %v2695_v24 = vld [vmem:[#allocation7 + $0x118] ss:$20 sps:$4 sm:$0xff]   ;;  %v2710_v28 = vld [vmem:[#allocation7 + $0xa8] ss:$20 sps:$4 sm:$0xff]  }
  0xe3   :  { %v2708_v25 = vld [vmem:[#allocation7 + $0xac] ss:$20 sps:$4 sm:$0xff]   ;;  %v2711_v29 = vld [vmem:[#allocation7 + $0xd4] ss:$20 sps:$4 sm:$0xff]   ;;  %v2713_v31 = vld [vmem:[#allocation7 + $0xd0] ss:$20 sps:$4 sm:$0xff]  }
  0xe4   :  { %610 = vmatpush1.bf16.msra.mxu1 %v2701_v15  ;;  %v3490_v26 = vld [vmem:[#allocation5] sm:$0xff]  ;;  %v2714_v32 = vld [vmem:[#allocation7 + $0xfc] ss:$20 sps:$4 sm:$0xff]   ;;  %v2716_v35 = vld [vmem:[#allocation7 + $0xf8] ss:$20 sps:$4 sm:$0xff]   ;;  %s3857_s5 = sld [smem:[#allocation31_spill]] }
  0xe5   :  { %559 = vmatpush1.bf16.msra.mxu0 %v2680_v6  ;;  %611 = vmatprep.subr.bf16.mxu1 %v2702_v16  ;;  %v3496_v30 = vpack.c.bf16 %v3492_v27, %v3490_v26  ;;  %v3498_v33 = vld [vmem:[#allocation5 + $0x10] sm:$0xff]  ;;  %v3500_v34 = vld [vmem:[#allocation5 + $0x18] sm:$0xff]  ;;  %vm727_vm0 = vcmask 261120   ;;  %vm228_vm1 = vcmask 60416   ;;  %v3521_v55 = vshrl.u32 %v321_v54, 7 }
  0xe6   :  { %560 = vmatprep.subr.bf16.mxu0 %v2681_v7  ;;  %v2717_v36 = vld [vmem:[#allocation7 + $0x124] ss:$20 sps:$4 sm:$0xff]   ;;  %v3506_v37 = vpack.c.bf16 %v3500_v34, %v3498_v33  ;;  %v2719_v38 = vld [vmem:[#allocation7 + $0x120] ss:$20 sps:$4 sm:$0xff]   ;;  %v2723_v42 = vld [vmem:[#allocation7 + $0x88] ss:$20 sps:$4 sm:$0xff]  }
  0xe7   :  { %v2720_v39 = vld [vmem:[#allocation7 + $0x10] ss:$20 sps:$4 sm:$0xff]   ;;  %v2721_v40 = vld [vmem:[#allocation7 + $0x38] ss:$20 sps:$4 sm:$0xff]   ;;  %v2722_v41 = vld [vmem:[#allocation7 + $0x60] ss:$20 sps:$4 sm:$0xff]  }
  0xe8   :  { %612 = vmatpush1.bf16.msra.mxu1 %v2704_v19  ;;  %v2724_v43 = vld [vmem:[#allocation7 + $0xb0] ss:$20 sps:$4 sm:$0xff]   ;;  %v2725_v44 = vld [vmem:[#allocation7 + $0xd8] ss:$20 sps:$4 sm:$0xff]   ;;  %v2726_v45 = vld [vmem:[#allocation7 + $0x100] ss:$20 sps:$4 sm:$0xff]  }
  0xe9   :  { %561 = vmatpush1.bf16.msra.mxu0 %v2683_v8  ;;  %613 = vmatprep.subr.bf16.mxu1 %v2705_v20  ;;  %v2727_v46 = vld [vmem:[#allocation7 + $0x128] ss:$20 sps:$4 sm:$0xff]   ;;  %v214_v48 = vld [vmem:[%s3827_s3] sm:$0xf]  ;;  %v2735_v50 = vld [vmem:[#allocation13 + $0x8] ss:$12 sps:$4 sm:$0xff]  }
  0xea   :  { %562 = vmatprep.subr.bf16.mxu0 %v2684_v9  ;;  %v2728_v47 = vld [vmem:[%s3857_s5] sm:$0xff]   ;;  %v229_v49 = vsel %vm228_vm1, %v214_v48, 0.0  ;;  %v2743_v52 = vld [vmem:[#allocation13 + $0x38] ss:$12 sps:$4 sm:$0xff]   ;;  %v3524_v56 = vsub.s32 0, %v3521_v55  ;;  %v3532_v58 = vsub.s32 1, %v3521_v55 }
  0xeb   :  { %230 = vadd.xlane.f32.xlu0 %v229_v49  ;;  %v2739_v51 = vld [vmem:[#allocation13 + $0x20] ss:$12 sps:$4 sm:$0xff]   ;;  %v2747_v53 = vld [vmem:[#allocation13 + $0x50] ss:$12 sps:$4 sm:$0xff]   ;;  %v2760_v49 = vld [vmem:[#allocation13 + $0xa8] ss:$12 sps:$4 sm:$0xff]  }
  0xec   :  { %614 = vmatpush1.bf16.msra.mxu1 %v2707_v23  ;;  %v3529_v57 = vld [vmem:[%s3830_s6] sm:$0x1f]  ;;  %v2738_v23 = vld [vmem:[#allocation13 + $0x1c] ss:$12 sps:$4 sm:$0xff]   ;;  %vm1532_vm2 = vcmask 1041409   ;;  %vm1535_vm3 = vcmask 1042434  }
  0xed   :  { %563 = vmatpush1.bf16.msra.mxu0 %v2686_v12  ;;  %615 = vmatprep.subr.bf16.mxu1 %v2708_v25  ;;  %v324_v59 = vrot.slane %v3529_v57, %v3524_v56  ;;  %v328_v61 = vrot.slane %v3529_v57, %v3532_v58  ;;  %v2730_v19 = vld [vmem:[#allocation2] sm:$0xff]   ;;  %v2742_v25 = vld [vmem:[#allocation13 + $0x34] ss:$12 sps:$4 sm:$0xff]   ;;  %v2332_v54 = vld [vmem:[#allocation8] ss:$0 sm:$0xff]  ;;  %vm1538_vm4 = vcmask 1043459  }
  0xee   :  { %564 = vmatprep.subr.bf16.mxu0 %v2687_v14  ;;  %v2734_v20 = vld [vmem:[#allocation13 + $0x4] ss:$12 sps:$4 sm:$0xff]   ;;  %v2762_v48 = vld [vmem:[#allocation13 + $0xac] ss:$12 sps:$4 sm:$0xff]   ;;  %vm1728_vm8 = vcmask 31744  }
  0xf0   :  { %616 = vmatpush1.bf16.msra.mxu1 %v2710_v28  ;;  %v2740_v28 = vld [vmem:[#allocation13 + $0x30] ss:$12 sps:$4 sm:$0xff]  }
  0xf1   :  { %565 = vmatpush1.bf16.msra.mxu0 %v2689_v17  ;;  %617 = vmatprep.subr.bf16.mxu1 %v2711_v29  ;;  %v2746_v29 = vld [vmem:[#allocation13 + $0x4c] ss:$12 sps:$4 sm:$0xff]  }
  0xf2   :  { %566 = vmatprep.subr.bf16.mxu0 %v2690_v18  ;;  %v2729_v18 = vld [vmem:[%s3857_s5 + $0x8] sm:$0xff]  }
  0xf4   :  { %618 = vmatpush1.bf16.msra.mxu1 %v2713_v31  ;;  %v2744_v31 = vld [vmem:[#allocation13 + $0x48] ss:$12 sps:$4 sm:$0xff]  }
  0xf5   :  { %567 = vmatpush1.bf16.msra.mxu0 %v2692_v21  ;;  %619 = vmatprep.subr.bf16.mxu1 %v2714_v32  ;;  %v2731_v21 = vld [vmem:[#allocation2 + $0x8] sm:$0xff]   ;;  %v2750_v32 = vld [vmem:[#allocation13 + $0x64] ss:$12 sps:$4 sm:$0xff]  }
  0xf6   :  { %568 = vmatprep.subr.bf16.mxu0 %v2693_v22  ;;  %v2732_v22 = vld [vmem:[#allocation13] ss:$12 sps:$4 sm:$0xff]  }
  0xf8   :  { %620 = vmatpush1.bf16.msra.mxu1 %v2716_v35  ;;  %v2748_v35 = vld [vmem:[#allocation13 + $0x60] ss:$12 sps:$4 sm:$0xff]  }
  0xf9   :  { %569 = vmatpush1.bf16.msra.mxu0 %v2695_v24  ;;  %621 = vmatprep.subr.bf16.mxu1 %v2717_v36  ;;  %v2736_v24 = vld [vmem:[#allocation13 + $0x18] ss:$12 sps:$4 sm:$0xff]  }
  0xfa   :  { %2529 = vmatprep.subr.bf16.mxu0 %v2735_v50 }
  0xfc   :  { %587 = vmatmul.mubr.bf16.vlgmr.msra.gmra.mrb[0].mxu0 %v3496_v30  ;;  %622 = vmatpush1.bf16.msra.mxu1 %v2719_v38 }
  0xfd   :  { %596 = vmatprep.mubr.bf16.mxu0 %v3239_v0  ;;  %2493 = vmatprep.subr.bf16.mxu1 %v2720_v39 }
  0xfe   :  { %2530 = vmatpush3.bf16.msra.mxu0 %v2735_v50  ;;  %v2763_v50 = vld [vmem:[#allocation13 + $0xb0] ss:$12 sps:$4 sm:$0xff]  }
  0xff   :  { %640 = vmatmul.mubr.bf16.vlgmr.msra.gmra.mrb[0].mxu1 %v3496_v30  ;;  %2531 = vmatprep.subr.bf16.mxu0 %v2739_v51 }
 0x100   :  { %2494 = vmatpush3.bf16.msra.mxu1 %v2720_v39  ;;  %649 = vmatprep.mubr.bf16.mxu1 %v3239_v0 }
 0x101   :  { %2495 = vmatprep.subr.bf16.mxu1 %v2721_v40 }
 0x102   :  { %2532 = vmatpush3.bf16.msra.mxu0 %v2739_v51  ;;  %v2766_v51 = vld [vmem:[#allocation11 + $0x4] ss:$12 sps:$4 sm:$0xff]  }
 0x103   :  { %2533 = vmatprep.subr.bf16.mxu0 %v2743_v52 }
 0x104   :  { %597 = vmatmul.mubr.bf16.gmra.mrb[4].mxu0 %v3506_v37  ;;  %2496 = vmatpush3.bf16.msra.mxu1 %v2721_v40 }
 0x105   :  { %2497 = vmatprep.subr.bf16.mxu1 %v2722_v41 }
 0x106   :  { %2534 = vmatpush3.bf16.msra.mxu0 %v2743_v52  ;;  %v2767_v52 = vld [vmem:[#allocation11 + $0x8] ss:$12 sps:$4 sm:$0xff]  }
 0x107   :  { %650 = vmatmul.mubr.bf16.gmra.mrb[4].mxu1 %v3506_v37  ;;  %2535 = vmatprep.subr.bf16.mxu0 %v2747_v53 }
 0x108   :  { %2498 = vmatpush3.bf16.msra.mxu1 %v2722_v41  ;;  %2509 = vmatprep.mubr.bf16.mxu1 %v3496_v30  ;;  %v2751_v41 = vld [vmem:[#allocation13 + $0x68] ss:$12 sps:$4 sm:$0xff]  }
 0x109   :  { %2499 = vmatprep.subr.bf16.mxu1 %v2723_v42 }
 0x10a   :  { %2536 = vmatpush3.bf16.msra.mxu0 %v2747_v53 }
 0x10b   :  { %2537 = vmatprep.subr.bf16.mxu0 %v2751_v41 }
 0x10c   :  { %2500 = vmatpush3.bf16.msra.mxu1 %v2723_v42  ;;  %v2754_v42 = vld [vmem:[#allocation13 + $0x7c] ss:$12 sps:$4 sm:$0xff]  }
 0x10d   :  { %2501 = vmatprep.subr.bf16.mxu1 %v2724_v43 }
 0x10e   :  { %2538 = vmatpush3.bf16.msra.mxu0 %v2751_v41  ;;  %v2786_v41 = vld [vmem:[#allocation11 + $0x7c] ss:$12 sps:$4 sm:$0xff]  }
 0x110   :  { %2502 = vmatpush3.bf16.msra.mxu1 %v2724_v43  ;;  %v2752_v43 = vld [vmem:[#allocation13 + $0x78] ss:$12 sps:$4 sm:$0xff]  }
 0x111   :  { %2503 = vmatprep.subr.bf16.mxu1 %v2725_v44 }
 0x114   :  { %2504 = vmatpush3.bf16.msra.mxu1 %v2725_v44  ;;  %v2755_v44 = vld [vmem:[#allocation13 + $0x80] ss:$12 sps:$4 sm:$0xff]  }
 0x115   :  { %2505 = vmatprep.subr.bf16.mxu1 %v2726_v45  ;;  %2539 = vmatprep.subr.bf16.mxu0 %v2755_v44 }
 0x116   :  { %2540 = vmatpush3.bf16.msra.mxu0 %v2755_v44 }
 0x118   :  { %2506 = vmatpush3.bf16.msra.mxu1 %v2726_v45  ;;  %v2758_v45 = vld [vmem:[#allocation13 + $0x94] ss:$12 sps:$4 sm:$0xff]  }
 0x119   :  { %2507 = vmatprep.subr.bf16.mxu1 %v2727_v46 }
 0x11c   :  { %2508 = vmatpush3.bf16.msra.mxu1 %v2727_v46  ;;  %v2756_v46 = vld [vmem:[#allocation13 + $0x90] ss:$12 sps:$4 sm:$0xff]  }
 0x11f   :  { %2510 = vmatmul.mubr.bf16.vlgmr.msra.gmra.mrb[8].mxu1 %v3506_v37 }
 0x120   :  { %2517 = vmatprep.mubr.msk.bf16.mxu1 %vm727_vm0, %v2728_v47  ;;  %v2759_v47 = vld [vmem:[#allocation13 + $0x98] ss:$12 sps:$4 sm:$0xff]  }
 0x121   :  { %2541 = vmatprep.subr.bf16.mxu0 %v2759_v47 }
 0x122   :  { %2542 = vmatpush3.bf16.msra.mxu0 %v2759_v47  ;;  %v2784_v47 = vld [vmem:[#allocation11 + $0x78] ss:$12 sps:$4 sm:$0xff]  }
 0x123   :  { %2543 = vmatprep.subr.bf16.mxu0 %v2763_v50 }
 0x126   :  { %2544 = vmatpush3.bf16.msra.mxu0 %v2763_v50 }
 0x127   :  { %2549 = vmatprep.subr.bf16.mxu0 %v2767_v52 }
 0x1cf   :  { %v588_v60 = vpop.f32.mrb[0].mxu0 }
 0x1d0   :  { %v590_v62 = vpop.f32.mrb[1].mxu0  ;;  %v589_v1 = vadd.f32 %v588_v60, %v324_v59 }
 0x1d1   :  { %v592_v63 = vpop.f32.mrb[2].mxu0  ;;  %v591_v4 = vadd.f32 %v590_v62, %v328_v61 }
 0x1d2   :  { %v593_v2 = vadd.f32 %v592_v63, %v324_v59  ;;  %v594_v3 = vpop.f32.mrb[3].mxu0 }
 0x1d3   :  { %v595_v5 = vadd.f32 %v594_v3, %v328_v61 }
 0x1d4   :  { %v709_v6 = vpack.c.bf16 %v593_v2, %v589_v1 }
 0x1d5   :  { %v783_v7 = vpack.c.bf16 %v595_v5, %v591_v4 }
 0x1d6   :  { %2513 = vmatprep.subr.bf16.mxu1 %v709_v6 }
 0x1d7   :  { %v598_v8 = vpop.f32.mrb[4].mxu0  ;;  %2514 = vmatpush3.bf16.msra.mxu1 %v709_v6  ;;  %v2337_v6 = vld [vmem:[#allocation10] ss:$0 sm:$0xff] }
 0x1d8   :  { %v600_v9 = vpop.f32.mrb[5].mxu0  ;;  %v599_v11 = vadd.f32 %v598_v8, %v324_v59 }
 0x1d9   :  { %v602_v10 = vpop.f32.mrb[6].mxu0  ;;  %v601_v14 = vadd.f32 %v600_v9, %v328_v61 }
 0x1da   :  { %v603_v12 = vadd.f32 %v602_v10, %v324_v59  ;;  %v604_v13 = vpop.f32.mrb[7].mxu0 }
 0x1db   :  { %v605_v15 = vadd.f32 %v604_v13, %v328_v61 }
 0x1dc   :  { %v710_v16 = vpack.c.bf16 %v603_v12, %v599_v11 }
 0x1dd   :  { %v784_v17 = vpack.c.bf16 %v605_v15, %v601_v14  ;;  %v2764_v15 = vld [vmem:[#allocation11] ss:$12 sps:$4 sm:$0xff]  }
 0x1de   :  { %2515 = vmatprep.subr.bf16.mxu1 %v710_v16 }
 0x1df   :  { %2516 = vmatpush3.bf16.msra.mxu1 %v710_v16 }
 0x1e0   :  { %2521 = vmatprep.subr.bf16.mxu1 %v783_v7 }
 0x1e2   :  { %2518 = vmatmul.mubr.msk.bf16.vlgmr.msra.gmra.mrb[12].mxu1 %vm727_vm0, %v2729_v18  ;;  %v2771_v18 = vld [vmem:[#allocation11 + $0x20] ss:$12 sps:$4 sm:$0xff]  }
 0x1e3   :  { %2522 = vmatpush3.bf16.msra.mxu1 %v783_v7  ;;  %2525 = vmatprep.mubr.msk.bf16.mxu1 %vm727_vm0, %v2730_v19  ;;  %v2768_v19 = vld [vmem:[#allocation11 + $0x18] ss:$12 sps:$4 sm:$0xff]  }
 0x1e4   :  { %2523 = vmatprep.subr.bf16.mxu1 %v784_v17 }
 0x1e7   :  { %2524 = vmatpush3.bf16.msra.mxu1 %v784_v17  ;;  %v2770_v17 = vld [vmem:[#allocation11 + $0x1c] ss:$12 sps:$4 sm:$0xff]  }
 0x1e8   :  { %1052 = vmatprep.subr.bf16.mxu1 %v2734_v20  ;;  %v2774_v20 = vld [vmem:[#allocation11 + $0x34] ss:$12 sps:$4 sm:$0xff]  }
 0x1ea   :  { %2526 = vmatmul.mubr.msk.bf16.vlgmr.msra.gmra.mrb[16].mxu1 %vm727_vm0, %v2731_v21  ;;  %v2775_v21 = vld [vmem:[#allocation11 + $0x38] ss:$12 sps:$4 sm:$0xff]  }
 0x1eb   :  { %1053 = vmatpush1.bf16.msra.mxu1 %v2732_v22  ;;  %1084 = vmatprep.mubr.bf16.mxu1 %v3239_v0  ;;  %v2772_v22 = vld [vmem:[#allocation11 + $0x30] ss:$12 sps:$4 sm:$0xff]  }
 0x1ec   :  { %1054 = vmatprep.subr.bf16.mxu1 %v2738_v23  ;;  %v2778_v23 = vld [vmem:[#allocation11 + $0x4c] ss:$12 sps:$4 sm:$0xff]  }
 0x1ef   :  { %1055 = vmatpush1.bf16.msra.mxu1 %v2736_v24  ;;  %v2779_v24 = vld [vmem:[#allocation11 + $0x50] ss:$12 sps:$4 sm:$0xff]  }
 0x1f0   :  { %1056 = vmatprep.subr.bf16.mxu1 %v2742_v25  ;;  %v2776_v25 = vld [vmem:[#allocation11 + $0x48] ss:$12 sps:$4 sm:$0xff]  }
 0x1f2   :  { %v3545_v36 = vpop.f32.mrb[8].mxu1 }
 0x1f3   :  { %1057 = vmatpush1.bf16.msra.mxu1 %v2740_v28  ;;  %v3547_v38 = vpop.f32.mrb[9].mxu1  ;;  %v2782_v28 = vld [vmem:[#allocation11 + $0x64] ss:$12 sps:$4 sm:$0xff]  }
 0x1f4   :  { %1058 = vmatprep.subr.bf16.mxu1 %v2746_v29  ;;  %v3549_v39 = vpop.f32.mrb[10].mxu1  ;;  %v2783_v29 = vld [vmem:[#allocation11 + $0x68] ss:$12 sps:$4 sm:$0xff]  }
 0x1f5   :  { %v3551_v40 = vpop.f32.mrb[11].mxu1 }
 0x1f7   :  { %1059 = vmatpush1.bf16.msra.mxu1 %v2744_v31  ;;  %v238_v31 = vrot.slane %v3492_v27, 4 }
 0x1f8   :  { %1060 = vmatprep.subr.bf16.mxu1 %v2750_v32  ;;  %v231_v32 = vpop.xlane.xlu0 %230 }
 0x1f9   :  { %v256_v44 = vadd.f32 1e-06, %v231_v32  ;;  %v2810_v32 = vld [vmem:[#allocation16 + $0x44] ss:$8 sps:$4 sm:$0xff]  }
 0x1fb   :  { %1061 = vmatpush1.bf16.msra.mxu1 %v2748_v35  ;;  %v2780_v35 = vld [vmem:[#allocation11 + $0x60] ss:$12 sps:$4 sm:$0xff]   ;;  %2836 = vrcp.f32 %v256_v44 }
 0x1fc   :  { %1062 = vmatprep.subr.bf16.mxu1 %v2754_v42  ;;  %v244_v42 = vrot.slane %v3498_v33, 4 }
 0x1fe   :  { %v245_v50 = vadd.f32 %v244_v42, %v3498_v33  ;;  %v2792_v33 = vld [vmem:[#allocation11 + $0xa8] ss:$12 sps:$4 sm:$0xff]   ;;  %v2808_v42 = vld [vmem:[#allocation16 + $0x40] ss:$8 sps:$4 sm:$0xff]  }
 0x1ff   :  { %1063 = vmatpush1.bf16.msra.mxu1 %v2752_v43  ;;  %v2787_v43 = vld [vmem:[#allocation11 + $0x80] ss:$12 sps:$4 sm:$0xff]  }
 0x200   :  { %1064 = vmatprep.subr.bf16.mxu1 %v2758_v45  ;;  %v232_v45 = vrot.slane %v3490_v26, 4 }
 0x203   :  { %1065 = vmatpush1.bf16.msra.mxu1 %v2756_v46  ;;  %v239_v46 = vadd.f32 %v238_v31, %v3492_v27  ;;  %v2794_v27 = vld [vmem:[#allocation11 + $0xac] ss:$12 sps:$4 sm:$0xff]  }
 0x204   :  { %1066 = vmatprep.subr.bf16.mxu1 %v2762_v48  ;;  %v250_v48 = vrot.slane %v3500_v34, 4 }
 0x207   :  { %1067 = vmatpush1.bf16.msra.mxu1 %v2760_v49  ;;  %v2790_v49 = vld [vmem:[#allocation11 + $0x94] ss:$12 sps:$4 sm:$0xff]  }
 0x208   :  { %1282 = vmatprep.subr.bf16.mxu1 %v2766_v51  ;;  %v2791_v51 = vld [vmem:[#allocation11 + $0x98] ss:$12 sps:$4 sm:$0xff]  }
 0x2b5   :  { %v2519_v53 = vpop.f32.mrb[12].mxu1 }
 0x2b6   :  { %v768_v59 = vpop.f32.mrb[13].mxu1  ;;  %v777_v61 = vadd.f32 %v2519_v53, %v2332_v54  ;;  %v240_v53 = vrot.slane %v239_v46, 2 }
 0x2b7   :  { %v2520_v60 = vpop.f32.mrb[14].mxu1  ;;  %v769_v1 = vadd.f32 %v2332_v54, %v768_v59  ;;  %v251_v59 = vadd.f32 %v250_v48, %v3500_v34 }
 0x2b8   :  { %v780_v62 = vadd.f32 %v2520_v60, %v2332_v54  ;;  %v771_v63 = vpop.f32.mrb[15].mxu1  ;;  %v246_v60 = vrot.slane %v245_v50, 2 }
 0x2b9   :  { %v772_v2 = vadd.f32 %v2332_v54, %v771_v63  ;;  %v2788_v54 = vld [vmem:[#allocation11 + $0x90] ss:$12 sps:$4 sm:$0xff]   ;;  %v241_v63 = vadd.f32 %v240_v53, %v239_v46 }
 0x2ba   :  { %v3553_v3 = vpack.c.bf16 %v780_v62, %v777_v61  ;;  %v2795_v61 = vld [vmem:[#allocation11 + $0xb0] ss:$12 sps:$4 sm:$0xff]  }
 0x2bb   :  { %v3555_v4 = vpack.c.bf16 %v772_v2, %v769_v1  ;;  %v252_v1 = vrot.slane %v251_v59, 2  ;;  %v2798_v2 = vld [vmem:[#allocation16 + $0x4] ss:$8 sps:$4 sm:$0xff]  }
 0x2bd   :  { %v2527_v5 = vpop.f32.mrb[16].mxu1  ;;  %v253_v34 = vadd.f32 %v252_v1, %v251_v59 }
 0x2be   :  { %v841_v7 = vpop.f32.mrb[17].mxu1  ;;  %v850_v9 = vadd.f32 %v2527_v5, %v2337_v6 }
 0x2bf   :  { %v2528_v8 = vpop.f32.mrb[18].mxu1  ;;  %v842_v12 = vadd.f32 %v2337_v6, %v841_v7  ;;  %v2837_v7 = vpop.eup %2836 }
 0x2c0   :  { %v853_v10 = vadd.f32 %v2528_v8, %v2337_v6  ;;  %v844_v11 = vpop.f32.mrb[19].mxu1  ;;  %v2796_v8 = vld [vmem:[#allocation16] ss:$8 sps:$4 sm:$0xff]  }
 0x2c1   :  { %v845_v13 = vadd.f32 %v2337_v6, %v844_v11  ;;  %v242_v6 = vrot.slane %v241_v63, 1 }
 0x2c2   :  { %v923_v14 = vpack.c.bf16 %v853_v10, %v850_v9  ;;  %v2801_v10 = vld [vmem:[#allocation16 + $0x14] ss:$8 sps:$4 sm:$0xff]  }
 0x2c3   :  { %v922_v16 = vpack.c.bf16 %v845_v13, %v842_v12  ;;  %v243_v12 = vadd.f32 %v242_v6, %v241_v63  ;;  %v259_v13 = vrot.slane %v2837_v7, 1  ;;  %v226_v63 = vld [vmem:[#allocation14] sm:$0x7] }
 0x2c4   :  { %v1388_v1 = vrot.slane %v226_v63, %v3524_v56 }
 0x2c5   :  { %1085 = vmatmul.mubr.bf16.vlgmr.msra.gmra.mrb[0].mxu1 %v922_v16  ;;  %2545 = vmatprep.mubr.bf16.mxu0 %v922_v16  ;;  %v2804_v16 = vld [vmem:[#allocation16 + $0x24] ss:$8 sps:$4 sm:$0xff]  }
 0x2c6   :  { %1283 = vmatpush1.bf16.msra.mxu1 %v2764_v15  ;;  %2546 = vmatmul.mubr.bf16.vlgmr.msra.gmra.mrb[8].mxu0 %v923_v14  ;;  %v254_v15 = vrot.slane %v253_v34, 1 }
 0x2c7   :  { %2550 = vmatpush3.bf16.msra.mxu0 %v2767_v52  ;;  %2565 = vmatprep.mubr.bf16.mxu0 %v3555_v4  ;;  %v233_v52 = vadd.f32 %v232_v45, %v3490_v26  ;;  %v247_v26 = vadd.f32 %v246_v60, %v245_v50 }
 0x2c8   :  { %1284 = vmatprep.subr.bf16.mxu1 %v2770_v17  ;;  %2551 = vmatprep.subr.bf16.mxu0 %v2771_v18 }
 0x2c9   :  { %1094 = vmatprep.mubr.bf16.mxu1 %v3239_v0  ;;  %v234_v62 = vrot.slane %v233_v52, 2  ;;  %v248_v9 = vrot.slane %v247_v26, 1 }
 0x2ca   :  { %1285 = vmatpush1.bf16.msra.mxu1 %v2768_v19 }
 0x2cb   :  { %2552 = vmatpush3.bf16.msra.mxu0 %v2771_v18  ;;  %1286 = vmatprep.subr.bf16.mxu1 %v2774_v20  ;;  %v235_v5 = vadd.f32 %v234_v62, %v233_v52  ;;  %v249_v17 = vadd.f32 %v248_v9, %v247_v26  ;;  %v260_v18 = vrot.slane %v2837_v7, 2  ;;  %v3571_v20 = vmul.f32 %v259_v13, %v243_v12  ;;  %v2814_v52 = vld [vmem:[#allocation16 + $0x60] ss:$8 sps:$4 sm:$0xff]  }
 0x2cc   :  { %2553 = vmatprep.subr.bf16.mxu0 %v2775_v21  ;;  %v331_v62 = vsub.s32 2, %v3521_v55 }
 0x2cd   :  { %1095 = vmatmul.mubr.bf16.gmra.mrb[4].mxu1 %v923_v14  ;;  %v236_v11 = vrot.slane %v235_v5, 1  ;;  %v2799_v14 = vld [vmem:[#allocation16 + $0x10] ss:$8 sps:$4 sm:$0xff]  }
 0x2ce   :  { %1287 = vmatpush1.bf16.msra.mxu1 %v2772_v22  ;;  %1314 = vmatprep.mubr.bf16.mxu1 %v3239_v0  ;;  %v255_v22 = vadd.f32 %v254_v15, %v253_v34 }
 0x2cf   :  { %2554 = vmatpush3.bf16.msra.mxu0 %v2775_v21  ;;  %1288 = vmatprep.subr.bf16.mxu1 %v2778_v23  ;;  %v237_v19 = vadd.f32 %v236_v11, %v235_v5  ;;  %v2802_v21 = vld [vmem:[#allocation16 + $0x20] ss:$8 sps:$4 sm:$0xff]   ;;  %v261_v23 = vrot.slane %v2837_v7, 3 }
 0x2d0   :  { %2555 = vmatprep.subr.bf16.mxu0 %v2779_v24 }
 0x2d1   :  { %v3581_v31 = vmul.f32 %v261_v23, %v255_v22 }
 0x2d2   :  { %1289 = vmatpush1.bf16.msra.mxu1 %v2776_v25  ;;  %v3576_v25 = vmul.f32 %v2837_v7, %v237_v19 }
 0x2d3   :  { %2556 = vmatpush3.bf16.msra.mxu0 %v2779_v24  ;;  %1290 = vmatprep.subr.bf16.mxu1 %v2782_v28  ;;  %v3573_v24 = vmul.f32 %v260_v18, %v249_v17  ;;  %v1509_v28 = vpack.c.bf16 %v3571_v20, %v3571_v20  ;;  %v1392_v17 = vrot.slane %v226_v63, %v3532_v58 }
 0x2d4   :  { %2557 = vmatprep.subr.bf16.mxu0 %v2783_v29 }
 0x2d6   :  { %1291 = vmatpush1.bf16.msra.mxu1 %v2780_v35  ;;  %v1510_v35 = vpack.c.bf16 %v3573_v24, %v3573_v24 }
 0x2d7   :  { %2558 = vmatpush3.bf16.msra.mxu0 %v2783_v29  ;;  %1292 = vmatprep.subr.bf16.mxu1 %v2786_v41  ;;  %v2805_v29 = vld [vmem:[#allocation16 + $0x30] ss:$8 sps:$4 sm:$0xff]   ;;  %v1508_v41 = vpack.c.bf16 %v3576_v25, %v3576_v25 }
 0x2d8   :  { %2559 = vmatprep.subr.bf16.mxu0 %v2787_v43  ;;  %v1529_v44 = vunpack.c.l.b16 %v1510_v35 }
 0x2d9   :  { %v1527_v45 = vunpack.c.l.b16 %v1508_v41 }
 0x2da   :  { %1293 = vmatpush1.bf16.msra.mxu1 %v2784_v47  ;;  %v2811_v47 = vld [vmem:[#allocation16 + $0x50] ss:$8 sps:$4 sm:$0xff]   ;;  %v1534_v50 = vrot.slane %v1529_v44, 6 }
 0x2db   :  { %2560 = vmatpush3.bf16.msra.mxu0 %v2787_v43  ;;  %1294 = vmatprep.subr.bf16.mxu1 %v2790_v49  ;;  %v1511_v43 = vpack.c.bf16 %v3581_v31, %v3581_v31  ;;  %v2816_v49 = vld [vmem:[#allocation16 + $0x64] ss:$8 sps:$4 sm:$0xff]  }
 0x2dc   :  { %2561 = vmatprep.subr.bf16.mxu0 %v2791_v51 }
 0x2dd   :  { %v1530_v48 = vunpack.c.l.b16 %v1511_v43 }
 0x2de   :  { %1295 = vmatpush1.bf16.msra.mxu1 %v2788_v54  ;;  %v2819_v54 = vld [vmem:[#allocation16 + $0x74] ss:$8 sps:$4 sm:$0xff]  }
 0x2df   :  { %2562 = vmatpush3.bf16.msra.mxu0 %v2791_v51  ;;  %1296 = vmatprep.subr.bf16.mxu1 %v2794_v27  ;;  %v1537_v53 = vrot.slane %v1530_v48, 5  ;;  %v2817_v27 = vld [vmem:[#allocation16 + $0x70] ss:$8 sps:$4 sm:$0xff]  }
 0x2e0   :  { %2563 = vmatprep.subr.bf16.mxu0 %v2795_v61 }
 0x2e2   :  { %1297 = vmatpush1.bf16.msra.mxu1 %v2792_v33  ;;  %v332_v33 = vrot.slane %v3529_v57, %v331_v62 }
 0x2e3   :  { %2564 = vmatpush3.bf16.msra.mxu0 %v2795_v61  ;;  %1622 = vmatprep.subr.bf16.mxu1 %v2798_v2  ;;  %v335_v2 = vsub.s32 3, %v3521_v55 }
 0x2e5   :  { %1315 = vmatmul.mubr.bf16.vlgmr.msra.gmra.mrb[0].mxu1 %v3555_v4  ;;  %v2807_v4 = vld [vmem:[#allocation16 + $0x34] ss:$8 sps:$4 sm:$0xff]  }
 0x2e6   :  { %2566 = vmatmul.mubr.bf16.vlgmr.msra.gmra.mrb[8].mxu0 %v3553_v3  ;;  %1324 = vmatprep.mubr.bf16.mxu1 %v3239_v0 }
 0x2e7   :  { %1623 = vmatpush1.bf16.msra.mxu1 %v2796_v8 }
 0x2e8   :  { %1624 = vmatprep.subr.bf16.mxu1 %v2801_v10  ;;  %v336_v10 = vrot.slane %v3529_v57, %v335_v2 }
 0x2eb   :  { %1625 = vmatpush1.bf16.msra.mxu1 %v2799_v14 }
 0x2ec   :  { %1626 = vmatprep.subr.bf16.mxu1 %v2804_v16 }
 0x2ed   :  { %1325 = vmatmul.mubr.bf16.gmra.mrb[4].mxu1 %v3553_v3  ;;  %v1528_v3 = vunpack.c.l.b16 %v1509_v28 }
 0x2ee   :  { %1654 = vmatprep.mubr.bf16.mxu1 %v3239_v0  ;;  %v2813_v0 = vld [vmem:[#allocation16 + $0x54] ss:$8 sps:$4 sm:$0xff]  }
 0x2ef   :  { %1627 = vmatpush1.bf16.msra.mxu1 %v2802_v21  ;;  %v1531_v46 = vrot.slane %v1528_v3, 7 }
 0x2f0   :  { %1628 = vmatprep.subr.bf16.mxu1 %v2807_v4 }
 0x2f1   :  { %v1533_v51 = vsel %vm1532_vm2, %v1531_v46, %v1527_v45 }
 0x2f2   :  { %v1536_v59 = vsel %vm1535_vm3, %v1534_v50, %v1533_v51 }
 0x2f3   :  { %1629 = vmatpush1.bf16.msra.mxu1 %v2805_v29  ;;  %v1539_v60 = vsel %vm1538_vm4, %v1537_v53, %v1536_v59  ;;  %v339_v53 = vsub.s32 4, %v3521_v55 }
 0x2f4   :  { %1630 = vmatprep.subr.bf16.mxu1 %v2810_v32  ;;  %v1540_v61 = vpack.c.b16 %v1539_v60, %v1539_v60 }
 0x2f5   :  { %v340_v60 = vrot.slane %v3529_v57, %v339_v53 }
 0x2f7   :  { %1631 = vmatpush1.bf16.msra.mxu1 %v2808_v42 }
 0x2f8   :  { %1632 = vmatprep.subr.bf16.mxu1 %v2813_v0 }
 0x2fb   :  { %1633 = vmatpush1.bf16.msra.mxu1 %v2811_v47 }
 0x2fc   :  { %1634 = vmatprep.subr.bf16.mxu1 %v2816_v49 }
 0x2ff   :  { %1635 = vmatpush1.bf16.msra.mxu1 %v2814_v52 }
 0x300   :  { %1636 = vmatprep.subr.bf16.mxu1 %v2819_v54 }
 0x303   :  { %1637 = vmatpush1.bf16.msra.mxu1 %v2817_v27 }
 0x306   :  { %1655 = vmatmul.mubr.bf16.vlgmr.msra.gmra.mrb[20].mxu1 %v1540_v61 }
 0x3b8   :  { %v1316_v26 = vpop.f32.mrb[0].mxu1 }
 0x3b9   :  { %v2609_v5 = vadd.f32 %v1316_v26, %v332_v33  ;;  %v1318_v6 = vpop.f32.mrb[1].mxu1  ;;  %v3596_v7 = vpop.f32.mrb[8].mxu0 }
 0x3ba   :  { %v1320_v34 = vpop.f32.mrb[2].mxu1  ;;  %v3598_v8 = vpop.f32.mrb[9].mxu0  ;;  %v2611_v18 = vadd.f32 %v1318_v6, %v336_v10  ;;  %v227_v6 = vld [vmem:[#allocation17] sm:$0x3] }
 0x3bb   :  { %v2610_v9 = vadd.f32 %v2609_v5, %v1388_v1  ;;  %v2613_v11 = vadd.f32 %v1320_v34, %v332_v33  ;;  %v1322_v12 = vpop.f32.mrb[3].mxu1  ;;  %v3601_v13 = vpop.f32.mrb[10].mxu0  ;;  %v1396_v5 = vrot.slane %v226_v63, %v331_v62  ;;  %v1520_v62 = vrot.slane %v227_v6, %v3532_v58 }
 0x3bc   :  { %v3603_v14 = vpop.f32.mrb[11].mxu0  ;;  %v2615_v22 = vadd.f32 %v1322_v12, %v336_v10  ;;  %v2612_v29 = vadd.f32 %v2611_v18, %v1392_v17  ;;  %v703_v58 = vadd.f32 %v3545_v36, %v340_v60 }
 0x3bd   :  { %v2390_v15 = vmul.f32 -1.442695, %v2610_v9  ;;  %v2614_v16 = vadd.f32 %v2613_v11, %v1388_v1 }
 0x3be   :  { %v2616_v3 = vadd.f32 %v2615_v22, %v1392_v17  ;;  %v2394_v0 = vmul.f32 -1.442695, %v2612_v29  ;;  %v1405_v22 = vadd.f32 %v1396_v5, %v3603_v14  ;;  %v706_v14 = vadd.f32 %v3549_v39, %v340_v60 }
 0x3bf   :  { %2838 = vpow2.f32 %v2390_v15  ;;  %v2391_v19 = vmul.f32 -1.442695, %v2614_v16  ;;  %v1516_v15 = vrot.slane %v227_v6, %v3524_v56  ;;  %v698_v16 = vadd.f32 %v3551_v40, %v340_v60 }
 0x3c0   :  { %v1326_v21 = vpop.f32.mrb[4].mxu1  ;;  %v2395_v47 = vmul.f32 -1.442695, %v2616_v3 }
 0x3c1   :  { %2840 = vpow2.f32 %v2391_v19  ;;  %v2617_v23 = vadd.f32 %v1326_v21, %v332_v33  ;;  %v1328_v4 = vpop.f32.mrb[5].mxu1 }
 0x3c2   :  { %v1330_v28 = vpop.f32.mrb[6].mxu1  ;;  %v2619_v44 = vadd.f32 %v1328_v4, %v336_v10 }
 0x3c3   :  { %v2618_v32 = vadd.f32 %v2617_v23, %v1388_v1  ;;  %v2621_v35 = vadd.f32 %v1330_v28, %v332_v33  ;;  %v1332_v41 = vpop.f32.mrb[7].mxu1  ;;  %v3240_v33 = vmov 1966171168  }
 0x3c4   :  { %v2623_v48 = vadd.f32 %v1332_v41, %v336_v10  ;;  %v2620_v51 = vadd.f32 %v2619_v44, %v1392_v17  ;;  %v695_v10 = vadd.f32 %v3547_v38, %v340_v60  ;;  %v3623_v60 = vld [vmem:[#allocation5] sm:$0xff] }
 0x3c5   :  { %v2392_v42 = vmul.f32 -1.442695, %v2618_v32  ;;  %v2622_v43 = vadd.f32 %v2621_v35, %v1388_v1  ;;  %v1665_v1 = vunpack.c.l.s4 %v3240_v33 }
 0x3c6   :  { %v2624_v54 = vadd.f32 %v2623_v48, %v1392_v17  ;;  %v2396_v59 = vmul.f32 -1.442695, %v2620_v51  ;;  %v1402_v17 = vadd.f32 %v1396_v5, %v3598_v8 }
 0x3c7   :  { %2842 = vpow2.f32 %v2392_v42  ;;  %v2393_v45 = vmul.f32 -1.442695, %v2622_v43  ;;  %v1666_v11 = vunpack.c.0.s8 %v1665_v1 }
 0x3c8   :  { %v2397_v61 = vmul.f32 -1.442695, %v2624_v54 }
 0x3c9   :  { %v2839_v46 = vpop.eup %2838  ;;  %2844 = vpow2.f32 %v2393_v45  ;;  %v1669_v4 = vsub.s32 %v1666_v11, %v3521_v55 }
 0x3ca   :  { %v1428_v49 = vadd.f32 1.0, %v2839_v46  ;;  %2846 = vpow2.f32 %v2394_v0  ;;  %v1408_v0 = vadd.f32 %v3596_v7, %v1396_v5 }
 0x3cb   :  { %v2841_v50 = vpop.eup %2840 }
 0x3cc   :  { %2848 = vrcp.f32 %v1428_v49  ;;  %v1429_v52 = vadd.f32 1.0, %v2841_v50  ;;  %v1411_v50 = vadd.f32 %v3601_v13, %v1396_v5 }
 0x3cd   :  { %2850 = vpow2.f32 %v2395_v47 }
 0x3ce   :  { %2852 = vrcp.f32 %v1429_v52 }
 0x3cf   :  { %2854 = vpow2.f32 %v2396_v59 }
 0x3d1   :  { %v2843_v27 = vpop.eup %2842 }
 0x3d2   :  { %v1430_v2 = vadd.f32 1.0, %v2843_v27 }
 0x3d3   :  { %v2845_v26 = vpop.eup %2844 }
 0x3d4   :  { %2856 = vrcp.f32 %v1430_v2  ;;  %v1431_v34 = vadd.f32 1.0, %v2845_v26  ;;  %v2847_v9 = vpop.eup %2846  ;;  %v3627_v26 = vld [vmem:[#allocation5 + $0x8] sm:$0xff] }
 0x3d5   :  { %2858 = vpow2.f32 %v2397_v61  ;;  %v1456_v19 = vadd.f32 1.0, %v2847_v9 }
 0x3d6   :  { %v2849_v12 = vpop.eup %2848  ;;  %2860 = vrcp.f32 %v1431_v34 }
 0x3d7   :  { %v2851_v57 = vpop.eup %2850  ;;  %v1468_v18 = vmul.f32 %v2849_v12, %v695_v10 }
 0x3d8   :  { %v2853_v63 = vpop.eup %2852  ;;  %v1457_v32 = vadd.f32 1.0, %v2851_v57 }
 0x3d9   :  { %v1472_v21 = vadd.f32 %v1468_v18, %v1402_v17  ;;  %v1469_v38 = vmul.f32 %v2853_v63, %v698_v16  ;;  %v1656_v23 = vpop.f32.mrb[20].mxu1  ;;  %v2855_v3 = vpop.eup %2854  ;;  %v3637_v17 = vld [vmem:[#allocation5 + $0x10] sm:$0xff] }
 0x3da   :  { %v1657_v28 = vadd.f32 %v1656_v23, %v1516_v15  ;;  %v1658_v29 = vpop.f32.mrb[21].mxu1  ;;  %v1458_v49 = vadd.f32 1.0, %v2855_v3  ;;  %v2821_v3 = vld [vmem:[#allocation19 + $0x8] sm:$0xff]  }
 0x3db   :  { %2862 = vtanh.f32 %v1472_v21  ;;  %v1473_v35 = vadd.f32 %v1469_v38, %v1405_v22  ;;  %v1659_v40 = vadd.f32 %v1658_v29, %v1520_v62  ;;  %v1660_v41 = vpop.f32.mrb[22].mxu1  ;;  %v3640_v21 = vld [vmem:[#allocation5 + $0x18] sm:$0xff] }
 0x3dc   :  { %2864 = vrcp.f32 %v1456_v19  ;;  %v1661_v8 = vpop.f32.mrb[23].mxu1  ;;  %v1670_v55 = vrot.slane %v1657_v28, %v1669_v4 }
 0x3dd   :  { %2866 = vtanh.f32 %v1473_v35  ;;  %v1823_v42 = vrot.slane %v1659_v40, %v1669_v4  ;;  %v2820_v8 = vld [vmem:[#allocation19] sm:$0xff]  }
 0x3de   :  { %v2857_v43 = vpop.eup %2856  ;;  %2868 = vrcp.f32 %v1457_v32  ;;  %v1671_v53 = vcombine.high %v1670_v55, %v1670_v55  ;;  %v1678_v7 = vrot.slane %v1670_v55, %v1669_v4  ;;  %2569 = vmatprep.subr.bf16.mxu0 %v2820_v8  ;;  %v3654_v55 = vld [vmem:[%s3828_s4 + $0x8] sm:$0xff] }
 0x3df   :  { %v2859_v44 = vpop.eup %2858  ;;  %v1824_v45 = vcombine.high %v1823_v42, %v1823_v42  ;;  %v3618_v46 = vrot.slane %v1823_v42, %v1669_v4  ;;  %v1470_v47 = vmul.f32 %v2857_v43, %v703_v58  ;;  %2570 = vmatpush3.bf16.msra.mxu0 %v2820_v8  ;;  %v2822_v58 = vld [vmem:[#allocation19 + $0x10] sm:$0xff]   ;;  %v2823_v42 = vld [vmem:[#allocation19 + $0x18] sm:$0xff]   ;;  %v2824_v43 = vld [vmem:[#allocation19 + $0x20] sm:$0xff]   ;;  %vm220_vm5 = vcmp.gt.f32.partialorder %v3654_v55, 0.5 }
 0x3e0   :  { %v2861_v48 = vpop.eup %2860  ;;  %v1459_v54 = vadd.f32 1.0, %v2859_v44  ;;  %v1685_v33 = vrot.slane %v1671_v53, %v1669_v4  ;;  %v1691_v2 = vrot.slane %v1678_v7, %v3524_v56  ;;  %v1686_v62 = vcombine.high %v1678_v7, %v1678_v7  ;;  %2571 = vmatprep.subr.bf16.mxu0 %v2821_v3 }
 0x3e1   :  { %v1474_v51 = vadd.f32 %v1470_v47, %v1408_v0  ;;  %v1471_v36 = vmul.f32 %v2861_v48, %v706_v14  ;;  %v3621_v52 = vrot.slane %v1824_v45, %v1669_v4  ;;  %v2825_v14 = vld [vmem:[#allocation19 + $0x28] sm:$0xff]   ;;  %v3664_v48 = vld [vmem:[%s3828_s4 + $0x10] sm:$0xff] }
 0x3e2   :  { %v1695_v10 = vrot.slane %v1685_v33, %v3524_v56  ;;  %v1687_v38 = vcombine.high %v1685_v33, %v1685_v33  ;;  %v1699_v28 = vrot.slane %v1686_v62, %v3524_v56  ;;  %v3659_v45 = vld [vmem:[%s3828_s4] sm:$0xff]  ;;  %vm221_vm7 = vcmp.gt.f32.partialorder %v3664_v48, 0.5 }
 0x3e3   :  { %2870 = vtanh.f32 %v1474_v51  ;;  %v1475_v39 = vadd.f32 %v1471_v36, %v1411_v50  ;;  %2572 = vmatpush3.bf16.msra.mxu0 %v2821_v3  ;;  %v3670_v50 = vld [vmem:[%s3828_s4 + $0x18] sm:$0xff]  ;;  %vm219_vm6 = vcmp.gt.f32.partialorder %v3659_v45, 0.5 }
 0x3e4   :  { %2872 = vrcp.f32 %v1458_v49  ;;  %v1703_v40 = vrot.slane %v1687_v38, %v3524_v56  ;;  %2573 = vmatprep.subr.bf16.mxu0 %v2822_v58  ;;  %vm222_vm9 = vcmp.gt.f32.partialorder %v3670_v50, 0.5 }
 0x3e5   :  { %v2863_v59 = vpop.eup %2862  ;;  %2874 = vtanh.f32 %v1475_v39 }
 0x3e6   :  { %v2865_v27 = vpop.eup %2864  ;;  %v1480_v61 = vsub.f32 %v3623_v60, %v2863_v59  ;;  %2876 = vrcp.f32 %v1459_v54 }
 0x3e7   :  { %v2867_v1 = vpop.eup %2866  ;;  %2574 = vmatpush3.bf16.msra.mxu0 %v2822_v58 }
 0x3e8   :  { %v1484_v13 = vmul.f32 %v2865_v27, %v1480_v61  ;;  %v1481_v5 = vsub.f32 %v3627_v26, %v2867_v1  ;;  %v2869_v6 = vpop.eup %2868  ;;  %2575 = vmatprep.subr.bf16.mxu0 %v2823_v42 }
 0x3ea   :  { %v3630_v34 = vadd.f32 %v2863_v59, %v1484_v13  ;;  %v1485_v9 = vmul.f32 %v2869_v6, %v1481_v5 }
 0x3eb   :  { %2576 = vmatpush3.bf16.msra.mxu0 %v2823_v42 }
 0x3ec   :  { %v1708_v11 = vmul.f32 %v1691_v2, %v3630_v34  ;;  %v3634_v12 = vadd.f32 %v2867_v1, %v1485_v9  ;;  %2577 = vmatprep.subr.bf16.mxu0 %v2824_v43 }
 0x3ed   :  { %v2871_v15 = vpop.eup %2870 }
 0x3ee   :  { %v2873_v57 = vpop.eup %2872  ;;  %1712 = vadd.xlane.f32.xlu0 %v1708_v11  ;;  %v1709_v16 = vmul.f32 %v1695_v10, %v3634_v12  ;;  %v1482_v18 = vsub.f32 %v3637_v17, %v2871_v15 }
 0x3ef   :  { %v2875_v63 = vpop.eup %2874  ;;  %2578 = vmatpush3.bf16.msra.mxu0 %v2824_v43 }
 0x3f0   :  { %1714 = vadd.xlane.f32.xlu1 %v1709_v16  ;;  %v1486_v19 = vmul.f32 %v2873_v57, %v1482_v18  ;;  %v1483_v22 = vsub.f32 %v3640_v21, %v2875_v63  ;;  %v2877_v23 = vpop.eup %2876  ;;  %2579 = vmatprep.subr.bf16.mxu0 %v2825_v14 }
 0x3f2   :  { %v3643_v4 = vadd.f32 %v2871_v15, %v1486_v19  ;;  %v1487_v29 = vmul.f32 %v2877_v23, %v1483_v22 }
 0x3f3   :  { %2580 = vmatpush3.bf16.msra.mxu0 %v2825_v14 }
 0x3f4   :  { %v1710_v32 = vmul.f32 %v1699_v28, %v3643_v4  ;;  %v3647_v35 = vadd.f32 %v2875_v63, %v1487_v29 }
 0x3f6   :  { %1716 = vadd.xlane.f32.xlu1 %v1710_v32  ;;  %v1711_v41 = vmul.f32 %v1703_v40, %v3647_v35 }
 0x3f8   :  { %1718 = vadd.xlane.f32.xlu0 %v1711_v41 }
 0x47b   :  { %v1713_v44 = vpop.xlane.xlu0 %1712 }
 0x47c   :  { %v1720_v49 = vmul.f32 0.088388346, %v1713_v44 }
 0x47d   :  { %v1715_v0 = vpop.xlane.xlu1 %1714 }
 0x47e   :  { %v1721_v47 = vmul.f32 0.088388346, %v1715_v0  ;;  %v1724_v39 = vsel %vm219_vm6, %v1720_v49, -1e+30 }
 0x47f   :  { %v1729_v33 = vsel %vm1728_vm8, %v1724_v39, -inf }
 0x480   :  { %v1725_v36 = vsel %vm220_vm5, %v1721_v47, -1e+30 }
 0x481   :  { %v1730_v27 = vsel %vm1728_vm8, %v1725_v36, -inf }
 0x482   :  { %v1733_v2 = vmax.f32 %v1729_v33, %v1730_v27 }
 0x483   :  { %v1717_v51 = vpop.xlane.xlu1 %1716 }
 0x484   :  { %v1722_v53 = vmul.f32 0.088388346, %v1717_v51 }
 0x485   :  { %v1719_v54 = vpop.xlane.xlu0 %1718 }
 0x486   :  { %v1726_v7 = vsel %vm221_vm7, %v1722_v53, -1e+30  ;;  %v1723_v59 = vmul.f32 0.088388346, %v1719_v54 }
 0x487   :  { %v1731_v1 = vsel %vm1728_vm8, %v1726_v7, -inf }
 0x488   :  { %v1727_v61 = vsel %vm222_vm9, %v1723_v59, -1e+30 }
 0x489   :  { %v1732_v13 = vsel %vm1728_vm8, %v1727_v61, -inf }
 0x48a   :  { %v1734_v5 = vmax.f32 %v1731_v1, %v1732_v13 }
 0x48c   :  { %v1735_v6 = vmax.f32 %v1733_v2, %v1734_v5  ;;  %v2826_v2 = vld [vmem:[#allocation19 + $0x30] sm:$0xff]   ;;  %v2827_v5 = vld [vmem:[#allocation19 + $0x38] sm:$0xff]  }
 0x48d   :  { %2581 = vmatprep.subr.bf16.mxu0 %v2826_v2 }
 0x48e   :  { %v1736_v9 = vrot.slane %v1735_v6, 4  ;;  %2582 = vmatpush3.bf16.msra.mxu0 %v2826_v2 }
 0x48f   :  { %2583 = vmatprep.subr.bf16.mxu0 %v2827_v5 }
 0x490   :  { %v1737_v10 = vmax.f32 %v1735_v6, %v1736_v9  ;;  %v2828_v6 = vld [vmem:[%s3838_s14] sm:$0xff]  }
 0x492   :  { %v1738_v11 = vrot.slane %v1737_v10, 2  ;;  %2584 = vmatpush3.bf16.msra.mxu0 %v2827_v5 }
 0x493   :  { %2589 = vmatprep.subr.bf16.mxu0 %v2828_v6 }
 0x494   :  { %v1739_v15 = vmax.f32 %v1737_v10, %v1738_v11  ;;  %v1791_v11 = vrot.slane %v3571_v20, %v3524_v56  ;;  %v1844_v20 = vrot.slane %v3618_v46, %v3524_v56 }
 0x496   :  { %v1740_v57 = vrot.slane %v1739_v15, 1 }
 0x498   :  { %v1741_v16 = vmax.f32 %v1739_v15, %v1740_v57  ;;  %v1787_v57 = vrot.slane %v3576_v25, %v3524_v56 }
 0x49a   :  { %v1742_v18 = vsub.f32 %v1724_v39, %v1741_v16  ;;  %v1744_v62 = vsub.f32 %v1726_v7, %v1741_v16  ;;  %v1743_v63 = vsub.f32 %v1725_v36, %v1741_v16  ;;  %v1745_v19 = vsub.f32 %v1727_v61, %v1741_v16 }
 0x49c   :  { %v1746_v22 = vmul.f32 1.442695, %v1742_v18  ;;  %v1750_v38 = vmul.f32 1.442695, %v1744_v62  ;;  %v1748_v23 = vmul.f32 1.442695, %v1743_v63 }
 0x49d   :  { %v1752_v28 = vmul.f32 1.442695, %v1745_v19 }
 0x49e   :  { %2878 = vpow2.f32 %v1746_v22  ;;  %v1799_v22 = vrot.slane %v3581_v31, %v3524_v56  ;;  %v1795_v31 = vrot.slane %v3573_v24, %v3524_v56 }
 0x49f   :  { %2880 = vpow2.f32 %v1750_v38 }
 0x4a0   :  { %2882 = vpow2.f32 %v1748_v23 }
 0x4a1   :  { %2884 = vpow2.f32 %v1752_v28  ;;  %v1848_v28 = vrot.slane %v3621_v52, %v3524_v56 }
 0x4a8   :  { %v2879_v29 = vpop.eup %2878 }
 0x4a9   :  { %v2881_v32 = vpop.eup %2880  ;;  %v1754_v40 = vsel %vm1728_vm8, %v2879_v29, 0.0 }
 0x4aa   :  { %v2883_v41 = vpop.eup %2882  ;;  %v1757_v42 = vsel %vm1728_vm8, %v2881_v32, 0.0 }
 0x4ab   :  { %v1755_v8 = vsel %vm1728_vm8, %v2883_v41, 0.0  ;;  %v2885_v3 = vpop.eup %2884 }
 0x4ac   :  { %v1756_v58 = vadd.f32 %v1755_v8, %v1754_v40  ;;  %v1759_v14 = vsel %vm1728_vm8, %v2885_v3, 0.0 }
 0x4ae   :  { %v1758_v43 = vadd.f32 %v1757_v42, %v1756_v58 }
 0x4b0   :  { %v1760_v0 = vadd.f32 %v1759_v14, %v1758_v43 }
 0x4b2   :  { %v1761_v44 = vrot.slane %v1760_v0, 4 }
 0x4b4   :  { %v1762_v47 = vadd.f32 %v1761_v44, %v1760_v0 }
 0x4b6   :  { %v1763_v49 = vrot.slane %v1762_v47, 2 }
 0x4b8   :  { %v1764_v51 = vadd.f32 %v1763_v49, %v1762_v47  ;;  %v2831_v49 = vld [vmem:[%s3838_s14 + $0x18] sm:$0xff]  }
 0x4ba   :  { %v1765_v36 = vrot.slane %v1764_v51, 1 }
 0x4bc   :  { %v1766_v53 = vadd.f32 %v1765_v36, %v1764_v51  ;;  %v2832_v51 = vld [vmem:[%s3838_s14 + $0x20] sm:$0xff]   ;;  %v2834_v36 = vld [vmem:[%s3838_s14 + $0x30] sm:$0xff]  }
 0x4be   :  { %2886 = vrcp.f32 %v1766_v53  ;;  %v2835_v53 = vld [vmem:[%s3838_s14 + $0x38] sm:$0xff]  }
 0x4c8   :  { %v2887_v54 = vpop.eup %2886 }
 0x4c9   :  { %v1769_v39 = vmul.f32 %v2887_v54, %v2883_v41  ;;  %v1768_v7 = vmul.f32 %v2887_v54, %v2879_v29  ;;  %v1771_v61 = vmul.f32 %v2887_v54, %v2885_v3  ;;  %v1770_v33 = vmul.f32 %v2887_v54, %v2881_v32 }
 0x4ca   :  { %v1839_v41 = vcombine.high %v3618_v46, %v3618_v46 }
 0x4cb   :  { %v1775_v59 = vsel %vm1728_vm8, %v1769_v39, 0.0  ;;  %v1772_v27 = vsel %vm1728_vm8, %v1768_v7, 0.0  ;;  %v1781_v1 = vsel %vm1728_vm8, %v1771_v61, 0.0  ;;  %v1778_v13 = vsel %vm1728_vm8, %v1770_v33, 0.0 }
 0x4cc   :  { %1776 = vadd.xlane.f32.xlu0 %v1775_v59  ;;  %1773 = vadd.xlane.f32.xlu1 %v1772_v27  ;;  %v1852_v46 = vrot.slane %v1839_v41, %v3524_v56 }
 0x4d0   :  { %1782 = vadd.xlane.f32.xlu0 %v1781_v1  ;;  %1779 = vadd.xlane.f32.xlu1 %v1778_v13 }
 0x559   :  { %v1777_v9 = vpop.xlane.xlu0 %1776  ;;  %v1774_v10 = vpop.xlane.xlu1 %1773 }
 0x55a   :  { %v1801_v15 = vsub.f32 1.0, %v1777_v9  ;;  %v1800_v16 = vsub.f32 1.0, %v1774_v10  ;;  %v1809_v62 = vmul.f32 %v1791_v11, %v1777_v9  ;;  %v1808_v19 = vmul.f32 %v1787_v57, %v1774_v10 }
 0x55c   :  { %v1805_v18 = vmul.f32 %v1801_v15, %v3634_v12  ;;  %v1804_v63 = vmul.f32 %v1800_v16, %v3630_v34  ;;  %v1840_v34 = vcombine.high %v3621_v52, %v3621_v52 }
 0x55d   :  { %v1783_v38 = vpop.xlane.xlu0 %1782  ;;  %v1780_v23 = vpop.xlane.xlu1 %1779 }
 0x55e   :  { %v3710_v29 = vadd.f32 %v1809_v62, %v1805_v18  ;;  %v3712_v25 = vadd.f32 %v1808_v19, %v1804_v63  ;;  %v1803_v12 = vsub.f32 1.0, %v1783_v38  ;;  %v1811_v32 = vmul.f32 %v1799_v22, %v1783_v38 }
 0x55f   :  { %v1802_v40 = vsub.f32 1.0, %v1780_v23  ;;  %v1810_v52 = vmul.f32 %v1795_v31, %v1780_v23  ;;  %v1856_v24 = vrot.slane %v1840_v34, %v3524_v56  ;;  %v2830_v56 = vld [vmem:[%s3838_s14 + $0x10] sm:$0xff]  }
 0x560   :  { %v1807_v8 = vmul.f32 %v1803_v12, %v3647_v35  ;;  %v1862_v3 = vmul.f32 %v1848_v28, %v3710_v29  ;;  %v1996_v58 = vpack.c.bf16 %v3710_v29, %v3712_v25  ;;  %v1861_v42 = vmul.f32 %v1844_v20, %v3712_v25 }
 0x561   :  { %v1806_v43 = vmul.f32 %v1802_v40, %v3643_v4  ;;  %v2829_v4 = vld [vmem:[%s3838_s14 + $0x8] sm:$0xff]  }
 0x562   :  { %v3726_v14 = vadd.f32 %v1811_v32, %v1807_v8  ;;  %1867 = vadd.xlane.f32.xlu0 %v1862_v3  ;;  %2585 = vmatprep.mubr.bf16.mxu0 %v1996_v58 }
 0x563   :  { %v3729_v0 = vadd.f32 %v1810_v52, %v1806_v43  ;;  %1865 = vadd.xlane.f32.xlu1 %v1861_v42 }
 0x564   :  { %v1864_v35 = vmul.f32 %v1856_v24, %v3726_v14 }
 0x565   :  { %v1997_v44 = vpack.c.bf16 %v3726_v14, %v3729_v0  ;;  %v1863_v47 = vmul.f32 %v1852_v46, %v3729_v0 }
 0x566   :  { %1871 = vadd.xlane.f32.xlu0 %v1864_v35 }
 0x567   :  { %2586 = vmatmul.mubr.bf16.vlgmr.msra.gmra.mrb[12].mxu0 %v1997_v44  ;;  %1869 = vadd.xlane.f32.xlu1 %v1863_v47 }
 0x568   :  { %2590 = vmatpush3.bf16.msra.mxu0 %v2828_v6  ;;  %2605 = vmatprep.mubr.bf16.mxu0 %v3496_v30  ;;  %v2833_v30 = vld [vmem:[%s3838_s14 + $0x28] sm:$0xff]  }
 0x569   :  { %2591 = vmatprep.subr.bf16.mxu0 %v2829_v4 }
 0x56c   :  { %2592 = vmatpush3.bf16.msra.mxu0 %v2829_v4 }
 0x56d   :  { %2593 = vmatprep.subr.bf16.mxu0 %v2830_v56 }
 0x570   :  { %2594 = vmatpush3.bf16.msra.mxu0 %v2830_v56 }
 0x571   :  { %2595 = vmatprep.subr.bf16.mxu0 %v2831_v49 }
 0x574   :  { %2596 = vmatpush3.bf16.msra.mxu0 %v2831_v49 }
 0x575   :  { %2597 = vmatprep.subr.bf16.mxu0 %v2832_v51 }
 0x578   :  { %2598 = vmatpush3.bf16.msra.mxu0 %v2832_v51 }
 0x579   :  { %2599 = vmatprep.subr.bf16.mxu0 %v2833_v30 }
 0x57c   :  { %2600 = vmatpush3.bf16.msra.mxu0 %v2833_v30 }
 0x57d   :  { %2601 = vmatprep.subr.bf16.mxu0 %v2834_v36 }
 0x580   :  { %2602 = vmatpush3.bf16.msra.mxu0 %v2834_v36 }
 0x581   :  { %2603 = vmatprep.subr.bf16.mxu0 %v2835_v53 }
 0x584   :  { %2604 = vmatpush3.bf16.msra.mxu0 %v2835_v53 }
 0x587   :  { %2606 = vmatmul.mubr.bf16.vlgmr.msra.gmra.mrb[12].mxu0 %v3506_v37 }
 0x5ef   :  { %v1868_v54 = vpop.xlane.xlu0 %1867 }
 0x5f0   :  { %v1874_v39 = vmul.f32 0.088388346, %v1868_v54  ;;  %v1866_v7 = vpop.xlane.xlu1 %1865 }
 0x5f1   :  { %v1873_v59 = vmul.f32 0.088388346, %v1866_v7 }
 0x5f2   :  { %v1878_v27 = vsel %vm220_vm5, %v1874_v39, -1e+30 }
 0x5f3   :  { %v1877_v61 = vsel %vm219_vm6, %v1873_v59, -1e+30  ;;  %v1872_v33 = vpop.xlane.xlu0 %1871  ;;  %v1882_v5 = vsel %vm1728_vm8, %v1878_v27, -inf  ;;  %v2430_v59 = vld [vmem:[%s3840_s16] ss:$0 sm:$0xff]  ;;  %s3241_s16 = smov [#allocation20]  }
 0x5f4   :  { %v1876_v1 = vmul.f32 0.088388346, %v1872_v33  ;;  %v1870_v13 = vpop.xlane.xlu1 %1869  ;;  %v1881_v6 = vsel %vm1728_vm8, %v1877_v61, -inf  ;;  %s2261_s6 = sshll.u32 %s3241_s16, 4  ;;  %s2262_s6 = int_to_ptr.vmem [resolvable:$true] %s2261_s6 }
 0x5f5   :  { %v1875_v2 = vmul.f32 0.088388346, %v1870_v13  ;;  %v1885_v45 = vmax.f32 %v1881_v6, %v1882_v5  ;;  %s3160_s1 = scalar_lea.vmem %s2262_s6, 512  ;;  %p3165_p5 = scmp.lt.s32.totalorder %s2262_s6, %s2262_s6 }
 0x5f6   :  { %v1880_v37 = vsel %vm222_vm9, %v1876_v1, -1e+30  ;;  %p3161_p4 = scmp.ne.s32.totalorder %s2262_s6, %s3160_s1  ;;  %p3166_p6 = scmp.lt.s32.totalorder %s3160_s1, %s3160_s1 }
 0x5f7   :  { %v1884_v9 = vsel %vm1728_vm8, %v1880_v37, -inf  ;;  %v1879_v55 = vsel %vm221_vm7, %v1875_v2, -1e+30 }
 0x5f8   :  { %v1883_v10 = vsel %vm1728_vm8, %v1879_v55, -inf  ;;  %p3167_p7 = por %p3166_p6, %p3165_p5 }
 0x5f9   :  { %v1886_v11 = vmax.f32 %v1883_v10, %v1884_v9 }
 0x5fa   :  { %p3168_p8 = pnand %p3167_p7, %p3161_p4 }
 0x5fb   :  { %v1887_v15 = vmax.f32 %v1885_v45, %v1886_v11 }
 0x5fd   :  { %v1888_v57 = vrot.slane %v1887_v15, 4 }
 0x5ff   :  { %v1889_v16 = vmax.f32 %v1887_v15, %v1888_v57 }
 0x601   :  { %v1890_v18 = vrot.slane %v1889_v16, 2 }
 0x603   :  { %v1891_v62 = vmax.f32 %v1889_v16, %v1890_v18 }
 0x605   :  { %v1892_v63 = vrot.slane %v1891_v62, 1 }
 0x607   :  { %v1893_v19 = vmax.f32 %v1891_v62, %v1892_v63 }
 0x609   :  { %v1894_v22 = vsub.f32 %v1877_v61, %v1893_v19  ;;  %v1896_v38 = vsub.f32 %v1879_v55, %v1893_v19  ;;  %v1895_v50 = vsub.f32 %v1878_v27, %v1893_v19  ;;  %v1897_v23 = vsub.f32 %v1880_v37, %v1893_v19 }
 0x60b   :  { %v1898_v28 = vmul.f32 1.442695, %v1894_v22  ;;  %v1902_v20 = vmul.f32 1.442695, %v1896_v38  ;;  %v1900_v12 = vmul.f32 1.442695, %v1895_v50 }
 0x60c   :  { %v1904_v48 = vmul.f32 1.442695, %v1897_v23 }
 0x60d   :  { %2888 = vpow2.f32 %v1898_v28 }
 0x60e   :  { %2890 = vpow2.f32 %v1902_v20 }
 0x60f   :  { %2892 = vpow2.f32 %v1900_v12 }
 0x610   :  { %2894 = vpow2.f32 %v1904_v48 }
 0x617   :  { %v2889_v34 = vpop.eup %2888 }
 0x618   :  { %v2891_v32 = vpop.eup %2890  ;;  %v1906_v31 = vsel %vm1728_vm8, %v2889_v34, 0.0 }
 0x619   :  { %v2893_v40 = vpop.eup %2892  ;;  %v1909_v58 = vsel %vm1728_vm8, %v2891_v32, 0.0 }
 0x61a   :  { %v1907_v41 = vsel %vm1728_vm8, %v2893_v40, 0.0  ;;  %v2895_v8 = vpop.eup %2894 }
 0x61b   :  { %v1908_v3 = vadd.f32 %v1907_v41, %v1906_v31  ;;  %v1911_v43 = vsel %vm1728_vm8, %v2895_v8, 0.0 }
 0x61d   :  { %v1910_v42 = vadd.f32 %v1909_v58, %v1908_v3 }
 0x61f   :  { %v1912_v52 = vadd.f32 %v1911_v43, %v1910_v42 }
 0x621   :  { %v1913_v24 = vrot.slane %v1912_v52, 4 }
 0x623   :  { %v1914_v46 = vadd.f32 %v1913_v24, %v1912_v52 }
 0x625   :  { %v1915_v35 = vrot.slane %v1914_v46, 2 }
 0x627   :  { %v1916_v44 = vadd.f32 %v1915_v35, %v1914_v46 }
 0x629   :  { %v1917_v47 = vrot.slane %v1916_v44, 1 }
 0x62b   :  { %v1918_v4 = vadd.f32 %v1917_v47, %v1916_v44 }
 0x62d   :  { %2896 = vrcp.f32 %v1918_v4 }
 0x637   :  { %v2897_v56 = vpop.eup %2896 }
 0x638   :  { %v1921_v49 = vmul.f32 %v2897_v56, %v2893_v40  ;;  %v1920_v51 = vmul.f32 %v2897_v56, %v2889_v34  ;;  %v1923_v53 = vmul.f32 %v2897_v56, %v2895_v8  ;;  %v1922_v54 = vmul.f32 %v2897_v56, %v2891_v32 }
 0x63a   :  { %v1927_v30 = vsel %vm1728_vm8, %v1921_v49, 0.0  ;;  %v1924_v36 = vsel %vm1728_vm8, %v1920_v51, 0.0  ;;  %v1933_v39 = vsel %vm1728_vm8, %v1923_v53, 0.0  ;;  %v1930_v7 = vsel %vm1728_vm8, %v1922_v54, 0.0 }
 0x63b   :  { %1928 = vadd.xlane.f32.xlu0 %v1927_v30  ;;  %1925 = vadd.xlane.f32.xlu1 %v1924_v36 }
 0x63f   :  { %1934 = vadd.xlane.f32.xlu0 %v1933_v39  ;;  %1931 = vadd.xlane.f32.xlu1 %v1930_v7 }
 0x65a   :  { %v2607_v27 = vpop.f32.mrb[12].mxu0 }
 0x65b   :  { %v2201_v61 = vadd.f32 %v2607_v27, %v2430_v59  ;;  %v2177_v33 = vpop.f32.mrb[13].mxu0 }
 0x65c   :  { %v2199_v1 = vadd.f32 %v2430_v59, %v2177_v33  ;;  %v2608_v13 = vpop.f32.mrb[14].mxu0 }
 0x65d   :  { %v2433_v2 = vmul.f32 -1.442695, %v2201_v61  ;;  %v2202_v5 = vadd.f32 %v2608_v13, %v2430_v59  ;;  %v2180_v6 = vpop.f32.mrb[15].mxu0 }
 0x65e   :  { %v2431_v37 = vmul.f32 -1.442695, %v2199_v1  ;;  %v2200_v9 = vadd.f32 %v2430_v59, %v2180_v6 }
 0x65f   :  { %2898 = vpow2.f32 %v2433_v2  ;;  %v2434_v55 = vmul.f32 -1.442695, %v2202_v5 }
 0x660   :  { %2900 = vpow2.f32 %v2431_v37  ;;  %v2432_v10 = vmul.f32 -1.442695, %v2200_v9 }
 0x661   :  { %2902 = vpow2.f32 %v2434_v55 }
 0x662   :  { %2904 = vpow2.f32 %v2432_v10 }
 0x669   :  { %v2899_v45 = vpop.eup %2898 }
 0x66a   :  { %v2901_v11 = vpop.eup %2900  ;;  %v2217_v15 = vadd.f32 1.0, %v2899_v45 }
 0x66b   :  { %v2903_v57 = vpop.eup %2902  ;;  %v2215_v16 = vadd.f32 1.0, %v2901_v11 }
 0x66c   :  { %v2905_v18 = vpop.eup %2904  ;;  %2906 = vrcp.f32 %v2217_v15  ;;  %v2218_v62 = vadd.f32 1.0, %v2903_v57 }
 0x66d   :  { %2908 = vrcp.f32 %v2215_v16  ;;  %v2216_v63 = vadd.f32 1.0, %v2905_v18 }
 0x66e   :  { %2910 = vrcp.f32 %v2218_v62 }
 0x66f   :  { %2912 = vrcp.f32 %v2216_v63 }
 0x676   :  { %v2907_v19 = vpop.eup %2906 }
 0x677   :  { %v2909_v22 = vpop.eup %2908  ;;  %v2233_v38 = vsub.f32 1.0, %v2907_v19  ;;  %v2229_v20 = vmul.f32 %v3637_v17, %v2907_v19 }
 0x678   :  { %v2911_v50 = vpop.eup %2910  ;;  %v2231_v23 = vsub.f32 1.0, %v2909_v22  ;;  %v2227_v34 = vmul.f32 %v3623_v60, %v2909_v22 }
 0x679   :  { %v2913_v28 = vpop.eup %2912  ;;  %v2234_v12 = vsub.f32 1.0, %v2911_v50  ;;  %v2237_v48 = vmul.f32 %v2233_v38, %v3729_v0  ;;  %v2230_v40 = vmul.f32 %v3640_v21, %v2911_v50 }
 0x67a   :  { %v2232_v32 = vsub.f32 1.0, %v2913_v28  ;;  %v2235_v31 = vmul.f32 %v2231_v23, %v3712_v25  ;;  %v2228_v3 = vmul.f32 %v3627_v26, %v2913_v28 }
 0x67b   :  { %v2238_v41 = vmul.f32 %v2234_v12, %v3726_v14  ;;  %v2241_v8 = vadd.f32 %v2237_v48, %v2229_v20 }
 0x67c   :  { %v2236_v58 = vmul.f32 %v2232_v32, %v3710_v29  ;;  %v2239_v17 = vadd.f32 %v2235_v31, %v2227_v34 }
 0x67d   :  { %v2242_v42 = vadd.f32 %v2238_v41, %v2230_v40  ;;  %2245 = vst [vmem:[#allocation20 + $0x10] sm:$0xff] %v2241_v8 }
 0x67e   :  { %v2240_v43 = vadd.f32 %v2236_v58, %v2228_v3  ;;  %2243 = vst [vmem:[#allocation20] sm:$0xff] %v2239_v17 }
 0x67f   :  { %2246 = vst [vmem:[#allocation20 + $0x18] sm:$0xff] %v2242_v42 }
 0x680   :  { %2244 = vst [vmem:[#allocation20 + $0x8] sm:$0xff] %v2240_v43 }
 0x681   :  { %3171 = shalt.err (!%p3168_p8)
}
 0x682   :  { %s3858_s21 = sld [smem:[#allocation34_spill]] }
 0x688   :  { %s3172_s10 = scalar_lea.hbm %s3858_s21, 512 }
 0x689   :  { %p3173_p9 = scmp.ne.s32.totalorder %s3858_s21, %s3172_s10  ;;  %p3176_p10 = scmp.lt.u32.totalorder %s3172_s10, %s3858_s21 }
 0x68b   :  { %p3178_p11 = pnand %p3176_p10, %p3173_p9 }
 0x68d   :  { %3181 = shalt.err (!%p3178_p11)
}
 0x68e   :  { %2267 = dma.vmem_to_hbm [thread:$0]  %s2262_s6, 512, %s3858_s21, [#allocation4], %s3221_s23, %s3221_s23, %s3222_s24  }
 0x68f   :  { %s3242_s23 = smov [#allocation21]  }
 0x690   :  { %s2274_s24 = sshll.u32 %s3242_s23, 4  ;;  %s2275_s24 = int_to_ptr.vmem [resolvable:$true] %s2274_s24 }
 0x691   :  { %s3182_s0 = scalar_lea.vmem %s2275_s24, 64  ;;  %p3187_p13 = scmp.lt.s32.totalorder %s2275_s24, %s2275_s24 }
 0x692   :  { %p3183_p12 = scmp.ne.s32.totalorder %s2275_s24, %s3182_s0  ;;  %p3188_p0 = scmp.lt.s32.totalorder %s3182_s0, %s3182_s0 }
 0x694   :  { %p3189_p1 = por %p3188_p0, %p3187_p13 }
 0x696   :  { %p3190_p2 = pnand %p3189_p1, %p3183_p12 }
 0x6c8   :  { %v1929_v60 = vpop.xlane.xlu0 %1928  ;;  %v1926_v26 = vpop.xlane.xlu1 %1925 }
 0x6c9   :  { %v1937_v21 = vmul.f32 %v1929_v60, %v3710_v29  ;;  %v1936_v52 = vmul.f32 %v1926_v26, %v3712_v25 }
 0x6cb   :  { %v1946_v24 = vrot.slane %v1937_v21, 4  ;;  %v1940_v46 = vrot.slane %v1936_v52, 4 }
 0x6cc   :  { %v1935_v35 = vpop.xlane.xlu0 %1934  ;;  %v1932_v44 = vpop.xlane.xlu1 %1931 }
 0x6cd   :  { %v1947_v47 = vadd.f32 %v1946_v24, %v1937_v21  ;;  %v1941_v4 = vadd.f32 %v1940_v46, %v1936_v52  ;;  %v1939_v56 = vmul.f32 %v1935_v35, %v3726_v14  ;;  %v1938_v49 = vmul.f32 %v1932_v44, %v3729_v0 }
 0x6cf   :  { %v1948_v51 = vrot.slane %v1947_v47, 2  ;;  %v1942_v30 = vrot.slane %v1941_v4, 2  ;;  %v1958_v36 = vrot.slane %v1939_v56, 4  ;;  %v1952_v53 = vrot.slane %v1938_v49, 4 }
 0x6d1   :  { %v1949_v54 = vadd.f32 %v1948_v51, %v1947_v47  ;;  %v1943_v39 = vadd.f32 %v1942_v30, %v1941_v4  ;;  %v1959_v7 = vadd.f32 %v1958_v36, %v1939_v56  ;;  %v1953_v29 = vadd.f32 %v1952_v53, %v1938_v49 }
 0x6d3   :  { %v1950_v59 = vrot.slane %v1949_v54, 1  ;;  %v1944_v25 = vrot.slane %v1943_v39, 1  ;;  %v1960_v27 = vrot.slane %v1959_v7, 2  ;;  %v1954_v61 = vrot.slane %v1953_v29, 2 }
 0x6d5   :  { %v1961_v33 = vadd.f32 %v1960_v27, %v1959_v7  ;;  %v1955_v1 = vadd.f32 %v1954_v61, %v1953_v29  ;;  %v1951_v13 = vadd.f32 %v1950_v59, %v1949_v54  ;;  %v1945_v2 = vadd.f32 %v1944_v25, %v1943_v39 }
 0x6d7   :  { %v1962_v5 = vrot.slane %v1961_v33, 1  ;;  %v1956_v14 = vrot.slane %v1955_v1, 1  ;;  %v2251_v37 = vsel %vm1532_vm2, %v1951_v13, %v1945_v2 }
 0x6d9   :  { %v1963_v0 = vadd.f32 %v1962_v5, %v1961_v33  ;;  %v1957_v6 = vadd.f32 %v1956_v14, %v1955_v1 }
 0x6db   :  { %v2252_v9 = vsel %vm1535_vm3, %v1957_v6, %v2251_v37 }
 0x6dc   :  { %v2253_v55 = vsel %vm1538_vm4, %v1963_v0, %v2252_v9 }
 0x6dd   :  { %2255 = vst [vmem:[#allocation21] sm:$0xf] %v2253_v55 }
 0x6de   :  { %3193 = shalt.err (!%p3190_p2)
}
 0x6df   :  { %s3859_s11 = sld [smem:[#allocation35_spill]] }
 0x6e5   :  { %s3194_s30 = scalar_lea.hbm %s3859_s11, 64 }
 0x6e6   :  { %p3195_p3 = scmp.ne.s32.totalorder %s3859_s11, %s3194_s30  ;;  %p3198_p4 = scmp.lt.u32.totalorder %s3194_s30, %s3859_s11 }
 0x6e8   :  { %p3200_p5 = pnand %p3198_p4, %p3195_p3 }
 0x6ea   :  { %3203 = shalt.err (!%p3200_p5)
}
 0x6eb   :  { %2277 = dma.vmem_to_hbm [thread:$0]  %s2275_s24, 64, %s3859_s11, [#allocation22]  }
 0x6ec   :  { %3216 = dma.done.wait [#allocation4], 512  }
 0x6ed   :  { %3217 = vsyncadd [#allocation4], 4294966784 }
 0x6ee   :  { %3218 = dma.done.wait [#allocation22], 64  }
 0x6ef   :  { %3219 = vsyncadd [#allocation22], 4294967232 }
 0x6f0   :  { %2284 = vsyncpa [#allocation3], 1 }
 0x6f1   :  { %2285 = vsyncpa [#allocation6], 1 }
 0x6f2   :  { %2286 = vsyncpa [#allocation9], 1 }
 0x6f3   :  { %2287 = vsyncpa [#allocation12], 1 }
 0x6f4   :  { %2288 = vsyncpa [#allocation15], 1 }
 0x6f5   :  { %2289 = vsyncpa [#allocation18], 1 }
 0x6f6   :  { %2290 = vsyncpa [#allocation4], 1 }
 0x6f7   :  { %2291 = vsyncpa [#allocation22], 1 }

</bundles_post_ra>
